<compile_context>
chip_gen: v7x
topology: tpu7x:2x2x1
jax: 0.10.0
libtpu: 0.0.40
codegen_flags: <defaults>
</compile_context>

<pallas_src>
import numpy as np
import jax
import jax.numpy as jnp
from jax import lax
from jax.experimental import pallas as pl
from jax.experimental.pallas import tpu as pltpu


def _corr_criterion_kernel(logits_ref, kp_ref, loss_ref):
    """One grid step == `bt` batch elements.

    logits_ref : (bt, K, C) VMEM tile, native dtype (C lane-dense)
    kp_ref     : (bt, R*K, 1) i32 VMEM tile (-1 == ignore_index)
    loss_ref   : (1, 1, bt) f32 per-batch min-over-rotation losses
    """
    bt, K, C = logits_ref.shape
    RK = kp_ref.shape[1]
    R = RK // K

    # Class iota along the lane axis, hoisted (shared by all elements/rotations).
    iota_c = lax.broadcasted_iota(jnp.int32, (RK, C), 1)

    losses = []
    for i in range(bt):                                  # bt: small static int
        # Upcast in VMEM (bf16 travels through HBM at half the bytes).
        x = logits_ref[i].astype(jnp.float32)                        # (K, C)

        # ---- log-sum-exp over classes C (lane reduction) ----
        m = jnp.max(x, axis=1, keepdims=True)                        # (K, 1)
        lse = jnp.log(jnp.sum(jnp.exp(x - m), axis=1, keepdims=True)) + m
        y = lse - x                                # -log_softmax, (K, C)

        # ---- fused gather for all R rotations at once ----
        t_col = kp_ref[i]                                            # (R*K, 1)
        valid_col = (t_col != -1).astype(jnp.float32)                # (R*K, 1)
        # NOTE: out-of-range targets (t >= C) silently contribute 0 (torch errors).
        match = iota_c == t_col                                      # (R*K, C)
        y_rep = jnp.concatenate([y] * R, axis=0)                     # (R*K, C)
        # t == -1 never matches any class, so ignored points contribute 0.
        nll_col = jnp.sum(jnp.where(match, y_rep, 0.0),
                          axis=1, keepdims=True)                     # (R*K, 1)

        # ---- per-rotation mean + min over rotations ----
        per_rot = []
        for r in range(R):                      # static; tiny (K, 1) sub-reduces
            sl = slice(r * K, (r + 1) * K)
            s = jnp.sum(nll_col[sl, :], axis=0, keepdims=True)       # (1, 1)
            c = jnp.sum(valid_col[sl, :], axis=0, keepdims=True)     # (1, 1)
            # Exact divide keeps the argmin over rotations stable.
            # (A fully-ignored rotation row gives c == 0 -> NaN, matching torch.)
            per_rot.append(s / c)
        per_rot = jnp.concatenate(per_rot, axis=1)                   # (1, R)
        losses.append(jnp.min(per_rot, axis=1, keepdims=True))       # (1, 1)

    # Single lane-contiguous store of all bt results for this grid step.
    loss_ref[0] = jnp.concatenate(losses, axis=1)                    # (1, bt)


def correspondence_criterion(outputs, kp_index):
    """outputs: (B, C, K) logits (f32 or bf16). kp_index: (B, R, K) ints (-1 ignored)."""
    B, C, K = outputs.shape
    R = kp_index.shape[1]

    # Lane-dense layout for the kernel: classes C on the 128-lane axis.
    # Dtype is passed through untouched (bf16 stays bf16 in HBM; upcast in VMEM).
    logits_t = jnp.transpose(outputs, (0, 2, 1))                 # (B, K, C)
    kp_col = kp_index.astype(jnp.int32).reshape(B, R * K, 1)     # (B, R*K, 1)

    in_itemsize = jnp.dtype(outputs.dtype).itemsize

    # ---- batch tile from a VMEM budget (safe under v5e's 16 MiB scoped default,
    #      v7x's 32 MiB scoped / 64 MiB physical) ----
    VMEM_BUDGET = 8 * 1024 * 1024
    blk_bytes = K * C * in_itemsize + R * K * 4                  # streamed per element
    work_bytes = 4 * K * C * 4 + 3 * R * K * C * 4               # f32 intermediates per element
    bt = max(1, VMEM_BUDGET // (2 * blk_bytes + work_bytes))     # x2: double buffering
    bt = int(min(bt, B, 16))                                     # cap unrolled code size
    if B >= 2:
        bt = int(min(bt, pl.cdiv(B, 2)))   # keep >= 2 grid steps: both v7x TCs busy
    grid = int(pl.cdiv(B, bt))
    B_pad = grid * bt
    if B_pad != B:
        # Pad the tail; padded rows use class-0 (valid) targets so they stay
        # finite, and are excluded from the final mean below.
        logits_t = jnp.pad(logits_t, ((0, B_pad - B), (0, 0), (0, 0)))
        kp_col = jnp.pad(kp_col, ((0, B_pad - B), (0, 0), (0, 0)))

    per_step = pl.pallas_call(
        _corr_criterion_kernel,
        out_shape=jax.ShapeDtypeStruct((grid, 1, bt), jnp.float32),
        grid_spec=pltpu.PrefetchScalarGridSpec(
            num_scalar_prefetch=0,
            grid=(grid,),
            in_specs=[
                pl.BlockSpec((bt, K, C), lambda g: (g, 0, 0)),
                pl.BlockSpec((bt, R * K, 1), lambda g: (g, 0, 0)),
            ],
            out_specs=pl.BlockSpec((1, 1, bt), lambda g: (g, 0, 0)),
        ),
        compiler_params=pltpu.CompilerParams(
            dimension_semantics=("parallel",),        # disjoint output blocks
            vmem_limit_bytes=32 * 1024 * 1024,
        ),
    )(logits_t, kp_col)

    per_batch = per_step.reshape(-1)[:B]
    # Final mean over the batch is a trivial reduction; do it in JAX.
    return jnp.mean(per_batch)


def _reference_loss(outputs_np, kp_np):
    """NumPy reference matching torch.nn.functional.cross_entropy semantics."""
    B, C, K = outputs_np.shape
    R = kp_np.shape[1]
    x = outputs_np.astype(np.float64)
    m = x.max(axis=1, keepdims=True)
    lse = np.log(np.exp(x - m).sum(axis=1, keepdims=True)) + m
    logp = x - lse                                                    # (B, C, K)
    per_b = []
    for b in range(B):
        per_r = []
        for r in range(R):
            t = kp_np[b, r]                                           # (K,)
            valid = t != -1
            g = logp[b, np.where(valid, t, 0), np.arange(K)]          # (K,)
            per_r.append((-g * valid).sum() / valid.sum())
        per_b.append(min(per_r))
    return float(np.mean(per_b))


if __name__ == "__main__":
    key = jax.random.PRNGKey(0)
    B, C, K, R = 16, 32, 8, 4  # batch, num points (classes), num keypoints, num rotations

    k1, k2, k3 = jax.random.split(key, 3)
    outputs = jax.random.normal(k1, (B, C, K), dtype=jnp.float32)     # logits (B, C, K)
    kp_index = jax.random.randint(k2, (B, R, K), 0, C, dtype=jnp.int32)
    # sprinkle some ignore_index entries (but never a fully-ignored row)
    ignore_mask = jax.random.bernoulli(k3, 0.2, (B, R, K))
    ignore_mask = ignore_mask.at[:, :, 0].set(False)
    kp_index = jnp.where(ignore_mask, -1, kp_index)

    loss = correspondence_criterion(outputs, kp_index)
    loss = jax.block_until_ready(loss)

    ref = _reference_loss(np.asarray(outputs), np.asarray(kp_index))
    assert np.allclose(float(loss), ref, rtol=1e-4, atol=1e-4), (float(loss), ref)

    print("KERNEL_OK")
</pallas_src>

<mosaic_0001>
module attributes {stable_mosaic.version = 11 : i64} {
  func.func @_corr_criterion_kernel(%arg0: i32, %arg1: memref<8x8x32xf32, #tpu.memory_space<vmem>>, %arg2: memref<8x32x1xi32, #tpu.memory_space<vmem>>, %arg3: memref<1x1x8xf32, #tpu.memory_space<vmem>>) attributes {dimension_semantics = [#tpu.dimension_semantics<parallel>], iteration_bounds = array<i64: 2>, scalar_prefetch = 0 : i64, scratch_operands = 0 : i64, tpu.core_type = #tpu.core_type<tc>, window_params = [{transform_indices = @transform_0, window_bounds = array<i64: 8, 8, 32>}, {transform_indices = @transform_1, window_bounds = array<i64: 8, 32, 1>}, {transform_indices = @transform_2, window_bounds = array<i64: 1, 1, 8>}]} {
    %0 = tpu.iota {dimensions = array<i32: 1>} : vector<32x32xi32>
    %c0 = arith.constant 0 : index
    %c0_0 = arith.constant 0 : index
    %c0_1 = arith.constant 0 : index
    %1 = vector.load %arg1[%c0, %c0_0, %c0_1] : memref<8x8x32xf32, #tpu.memory_space<vmem>>, vector<1x8x32xf32>
    %2 = vector.shape_cast %1 : vector<1x8x32xf32> to vector<8x32xf32>
    %cst = arith.constant dense<0xFF800000> : vector<8xf32>
    %3 = vector.multi_reduction <maximumf>, %2, %cst [1] : vector<8x32xf32> to vector<8xf32>
    %4 = vector.shape_cast %3 : vector<8xf32> to vector<8x1xf32>
    %5 = vector.broadcast %4 : vector<8x1xf32> to vector<8x32xf32>
    %6 = arith.subf %2, %5 : vector<8x32xf32>
    %7 = math.exp %6 : vector<8x32xf32>
    %cst_2 = arith.constant dense<0.000000e+00> : vector<8xf32>
    %8 = vector.multi_reduction <add>, %7, %cst_2 [1] : vector<8x32xf32> to vector<8xf32>
    %9 = vector.shape_cast %8 : vector<8xf32> to vector<8x1xf32>
    %10 = math.log %9 : vector<8x1xf32>
    %11 = arith.addf %10, %4 : vector<8x1xf32>
    %12 = vector.broadcast %11 : vector<8x1xf32> to vector<8x32xf32>
    %13 = arith.subf %12, %2 : vector<8x32xf32>
    %c0_3 = arith.constant 0 : index
    %c0_4 = arith.constant 0 : index
    %c0_5 = arith.constant 0 : index
    %14 = vector.load %arg2[%c0_3, %c0_4, %c0_5] : memref<8x32x1xi32, #tpu.memory_space<vmem>>, vector<1x32x1xi32>
    %15 = vector.shape_cast %14 : vector<1x32x1xi32> to vector<32x1xi32>
    %c-1_i32 = arith.constant -1 : i32
    %16 = vector.broadcast %c-1_i32 : i32 to vector<32x1xi32>
    %17 = arith.cmpi ne, %15, %16 : vector<32x1xi32>
    %18 = arith.extui %17 : vector<32x1xi1> to vector<32x1xi32>
    %19 = arith.sitofp %18 : vector<32x1xi32> to vector<32x1xf32>
    %20 = vector.broadcast %15 : vector<32x1xi32> to vector<32x32xi32>
    %21 = arith.cmpi eq, %0, %20 : vector<32x32xi32>
    %22 = tpu.concatenate %13, %13, %13, %13 in 0 : vector<8x32xf32>, vector<8x32xf32>, vector<8x32xf32>, vector<8x32xf32> -> vector<32x32xf32>
    %cst_6 = arith.constant 0.000000e+00 : f32
    %23 = vector.broadcast %cst_6 : f32 to vector<32x32xf32>
    %24 = arith.select %21, %22, %23 : vector<32x32xi1>, vector<32x32xf32>
    %cst_7 = arith.constant dense<0.000000e+00> : vector<32xf32>
    %25 = vector.multi_reduction <add>, %24, %cst_7 [1] : vector<32x32xf32> to vector<32xf32>
    %26 = vector.shape_cast %25 : vector<32xf32> to vector<32x1xf32>
    %27 = vector.extract_strided_slice %26 {offsets = [0, 0], sizes = [8, 1], strides = [1, 1]} : vector<32x1xf32> to vector<8x1xf32>
    %cst_8 = arith.constant dense<0.000000e+00> : vector<1xf32>
    %28 = vector.multi_reduction <add>, %27, %cst_8 [0] : vector<8x1xf32> to vector<1xf32>
    %29 = vector.shape_cast %28 : vector<1xf32> to vector<1x1xf32>
    %30 = vector.extract_strided_slice %19 {offsets = [0, 0], sizes = [8, 1], strides = [1, 1]} : vector<32x1xf32> to vector<8x1xf32>
    %cst_9 = arith.constant dense<0.000000e+00> : vector<1xf32>
    %31 = vector.multi_reduction <add>, %30, %cst_9 [0] : vector<8x1xf32> to vector<1xf32>
    %32 = vector.shape_cast %31 : vector<1xf32> to vector<1x1xf32>
    %33 = arith.divf %29, %32 : vector<1x1xf32>
    %34 = vector.extract_strided_slice %26 {offsets = [8, 0], sizes = [8, 1], strides = [1, 1]} : vector<32x1xf32> to vector<8x1xf32>
    %cst_10 = arith.constant dense<0.000000e+00> : vector<1xf32>
    %35 = vector.multi_reduction <add>, %34, %cst_10 [0] : vector<8x1xf32> to vector<1xf32>
    %36 = vector.shape_cast %35 : vector<1xf32> to vector<1x1xf32>
    %37 = vector.extract_strided_slice %19 {offsets = [8, 0], sizes = [8, 1], strides = [1, 1]} : vector<32x1xf32> to vector<8x1xf32>
    %cst_11 = arith.constant dense<0.000000e+00> : vector<1xf32>
    %38 = vector.multi_reduction <add>, %37, %cst_11 [0] : vector<8x1xf32> to vector<1xf32>
    %39 = vector.shape_cast %38 : vector<1xf32> to vector<1x1xf32>
    %40 = arith.divf %36, %39 : vector<1x1xf32>
    %41 = vector.extract_strided_slice %26 {offsets = [16, 0], sizes = [8, 1], strides = [1, 1]} : vector<32x1xf32> to vector<8x1xf32>
    %cst_12 = arith.constant dense<0.000000e+00> : vector<1xf32>
    %42 = vector.multi_reduction <add>, %41, %cst_12 [0] : vector<8x1xf32> to vector<1xf32>
    %43 = vector.shape_cast %42 : vector<1xf32> to vector<1x1xf32>
    %44 = vector.extract_strided_slice %19 {offsets = [16, 0], sizes = [8, 1], strides = [1, 1]} : vector<32x1xf32> to vector<8x1xf32>
    %cst_13 = arith.constant dense<0.000000e+00> : vector<1xf32>
    %45 = vector.multi_reduction <add>, %44, %cst_13 [0] : vector<8x1xf32> to vector<1xf32>
    %46 = vector.shape_cast %45 : vector<1xf32> to vector<1x1xf32>
    %47 = arith.divf %43, %46 : vector<1x1xf32>
    %48 = vector.extract_strided_slice %26 {offsets = [24, 0], sizes = [8, 1], strides = [1, 1]} : vector<32x1xf32> to vector<8x1xf32>
    %cst_14 = arith.constant dense<0.000000e+00> : vector<1xf32>
    %49 = vector.multi_reduction <add>, %48, %cst_14 [0] : vector<8x1xf32> to vector<1xf32>
    %50 = vector.shape_cast %49 : vector<1xf32> to vector<1x1xf32>
    %51 = vector.extract_strided_slice %19 {offsets = [24, 0], sizes = [8, 1], strides = [1, 1]} : vector<32x1xf32> to vector<8x1xf32>
    %cst_15 = arith.constant dense<0.000000e+00> : vector<1xf32>
    %52 = vector.multi_reduction <add>, %51, %cst_15 [0] : vector<8x1xf32> to vector<1xf32>
    %53 = vector.shape_cast %52 : vector<1xf32> to vector<1x1xf32>
    %54 = arith.divf %50, %53 : vector<1x1xf32>
    %55 = tpu.concatenate %33, %40, %47, %54 in 1 : vector<1x1xf32>, vector<1x1xf32>, vector<1x1xf32>, vector<1x1xf32> -> vector<1x4xf32>
    %cst_16 = arith.constant dense<0x7F800000> : vector<1xf32>
    %56 = vector.multi_reduction <minimumf>, %55, %cst_16 [1] : vector<1x4xf32> to vector<1xf32>
    %57 = vector.shape_cast %56 : vector<1xf32> to vector<1x1xf32>
    %c1 = arith.constant 1 : index
    %c0_17 = arith.constant 0 : index
    %c0_18 = arith.constant 0 : index
    %58 = vector.load %arg1[%c1, %c0_17, %c0_18] : memref<8x8x32xf32, #tpu.memory_space<vmem>>, vector<1x8x32xf32>
    %59 = vector.shape_cast %58 : vector<1x8x32xf32> to vector<8x32xf32>
    %cst_19 = arith.constant dense<0xFF800000> : vector<8xf32>
    %60 = vector.multi_reduction <maximumf>, %59, %cst_19 [1] : vector<8x32xf32> to vector<8xf32>
    %61 = vector.shape_cast %60 : vector<8xf32> to vector<8x1xf32>
    %62 = vector.broadcast %61 : vector<8x1xf32> to vector<8x32xf32>
    %63 = arith.subf %59, %62 : vector<8x32xf32>
    %64 = math.exp %63 : vector<8x32xf32>
    %cst_20 = arith.constant dense<0.000000e+00> : vector<8xf32>
    %65 = vector.multi_reduction <add>, %64, %cst_20 [1] : vector<8x32xf32> to vector<8xf32>
    %66 = vector.shape_cast %65 : vector<8xf32> to vector<8x1xf32>
    %67 = math.log %66 : vector<8x1xf32>
    %68 = arith.addf %67, %61 : vector<8x1xf32>
    %69 = vector.broadcast %68 : vector<8x1xf32> to vector<8x32xf32>
    %70 = arith.subf %69, %59 : vector<8x32xf32>
    %c1_21 = arith.constant 1 : index
    %c0_22 = arith.constant 0 : index
    %c0_23 = arith.constant 0 : index
    %71 = vector.load %arg2[%c1_21, %c0_22, %c0_23] : memref<8x32x1xi32, #tpu.memory_space<vmem>>, vector<1x32x1xi32>
    %72 = vector.shape_cast %71 : vector<1x32x1xi32> to vector<32x1xi32>
    %c-1_i32_24 = arith.constant -1 : i32
    %73 = vector.broadcast %c-1_i32_24 : i32 to vector<32x1xi32>
    %74 = arith.cmpi ne, %72, %73 : vector<32x1xi32>
    %75 = arith.extui %74 : vector<32x1xi1> to vector<32x1xi32>
    %76 = arith.sitofp %75 : vector<32x1xi32> to vector<32x1xf32>
    %77 = vector.broadcast %72 : vector<32x1xi32> to vector<32x32xi32>
    %78 = arith.cmpi eq, %0, %77 : vector<32x32xi32>
    %79 = tpu.concatenate %70, %70, %70, %70 in 0 : vector<8x32xf32>, vector<8x32xf32>, vector<8x32xf32>, vector<8x32xf32> -> vector<32x32xf32>
    %cst_25 = arith.constant 0.000000e+00 : f32
    %80 = vector.broadcast %cst_25 : f32 to vector<32x32xf32>
    %81 = arith.select %78, %79, %80 : vector<32x32xi1>, vector<32x32xf32>
    %cst_26 = arith.constant dense<0.000000e+00> : vector<32xf32>
    %82 = vector.multi_reduction <add>, %81, %cst_26 [1] : vector<32x32xf32> to vector<32xf32>
    %83 = vector.shape_cast %82 : vector<32xf32> to vector<32x1xf32>
    %84 = vector.extract_strided_slice %83 {offsets = [0, 0], sizes = [8, 1], strides = [1, 1]} : vector<32x1xf32> to vector<8x1xf32>
    %cst_27 = arith.constant dense<0.000000e+00> : vector<1xf32>
    %85 = vector.multi_reduction <add>, %84, %cst_27 [0] : vector<8x1xf32> to vector<1xf32>
    %86 = vector.shape_cast %85 : vector<1xf32> to vector<1x1xf32>
    %87 = vector.extract_strided_slice %76 {offsets = [0, 0], sizes = [8, 1], strides = [1, 1]} : vector<32x1xf32> to vector<8x1xf32>
    %cst_28 = arith.constant dense<0.000000e+00> : vector<1xf32>
    %88 = vector.multi_reduction <add>, %87, %cst_28 [0] : vector<8x1xf32> to vector<1xf32>
    %89 = vector.shape_cast %88 : vector<1xf32> to vector<1x1xf32>
    %90 = arith.divf %86, %89 : vector<1x1xf32>
    %91 = vector.extract_strided_slice %83 {offsets = [8, 0], sizes = [8, 1], strides = [1, 1]} : vector<32x1xf32> to vector<8x1xf32>
    %cst_29 = arith.constant dense<0.000000e+00> : vector<1xf32>
    %92 = vector.multi_reduction <add>, %91, %cst_29 [0] : vector<8x1xf32> to vector<1xf32>
    %93 = vector.shape_cast %92 : vector<1xf32> to vector<1x1xf32>
    %94 = vector.extract_strided_slice %76 {offsets = [8, 0], sizes = [8, 1], strides = [1, 1]} : vector<32x1xf32> to vector<8x1xf32>
    %cst_30 = arith.constant dense<0.000000e+00> : vector<1xf32>
    %95 = vector.multi_reduction <add>, %94, %cst_30 [0] : vector<8x1xf32> to vector<1xf32>
    %96 = vector.shape_cast %95 : vector<1xf32> to vector<1x1xf32>
    %97 = arith.divf %93, %96 : vector<1x1xf32>
    %98 = vector.extract_strided_slice %83 {offsets = [16, 0], sizes = [8, 1], strides = [1, 1]} : vector<32x1xf32> to vector<8x1xf32>
    %cst_31 = arith.constant dense<0.000000e+00> : vector<1xf32>
    %99 = vector.multi_reduction <add>, %98, %cst_31 [0] : vector<8x1xf32> to vector<1xf32>
    %100 = vector.shape_cast %99 : vector<1xf32> to vector<1x1xf32>
    %101 = vector.extract_strided_slice %76 {offsets = [16, 0], sizes = [8, 1], strides = [1, 1]} : vector<32x1xf32> to vector<8x1xf32>
    %cst_32 = arith.constant dense<0.000000e+00> : vector<1xf32>
    %102 = vector.multi_reduction <add>, %101, %cst_32 [0] : vector<8x1xf32> to vector<1xf32>
    %103 = vector.shape_cast %102 : vector<1xf32> to vector<1x1xf32>
    %104 = arith.divf %100, %103 : vector<1x1xf32>
    %105 = vector.extract_strided_slice %83 {offsets = [24, 0], sizes = [8, 1], strides = [1, 1]} : vector<32x1xf32> to vector<8x1xf32>
    %cst_33 = arith.constant dense<0.000000e+00> : vector<1xf32>
    %106 = vector.multi_reduction <add>, %105, %cst_33 [0] : vector<8x1xf32> to vector<1xf32>
    %107 = vector.shape_cast %106 : vector<1xf32> to vector<1x1xf32>
    %108 = vector.extract_strided_slice %76 {offsets = [24, 0], sizes = [8, 1], strides = [1, 1]} : vector<32x1xf32> to vector<8x1xf32>
    %cst_34 = arith.constant dense<0.000000e+00> : vector<1xf32>
    %109 = vector.multi_reduction <add>, %108, %cst_34 [0] : vector<8x1xf32> to vector<1xf32>
    %110 = vector.shape_cast %109 : vector<1xf32> to vector<1x1xf32>
    %111 = arith.divf %107, %110 : vector<1x1xf32>
    %112 = tpu.concatenate %90, %97, %104, %111 in 1 : vector<1x1xf32>, vector<1x1xf32>, vector<1x1xf32>, vector<1x1xf32> -> vector<1x4xf32>
    %cst_35 = arith.constant dense<0x7F800000> : vector<1xf32>
    %113 = vector.multi_reduction <minimumf>, %112, %cst_35 [1] : vector<1x4xf32> to vector<1xf32>
    %114 = vector.shape_cast %113 : vector<1xf32> to vector<1x1xf32>
    %c2 = arith.constant 2 : index
    %c0_36 = arith.constant 0 : index
    %c0_37 = arith.constant 0 : index
    %115 = vector.load %arg1[%c2, %c0_36, %c0_37] : memref<8x8x32xf32, #tpu.memory_space<vmem>>, vector<1x8x32xf32>
    %116 = vector.shape_cast %115 : vector<1x8x32xf32> to vector<8x32xf32>
    %cst_38 = arith.constant dense<0xFF800000> : vector<8xf32>
    %117 = vector.multi_reduction <maximumf>, %116, %cst_38 [1] : vector<8x32xf32> to vector<8xf32>
    %118 = vector.shape_cast %117 : vector<8xf32> to vector<8x1xf32>
    %119 = vector.broadcast %118 : vector<8x1xf32> to vector<8x32xf32>
    %120 = arith.subf %116, %119 : vector<8x32xf32>
    %121 = math.exp %120 : vector<8x32xf32>
    %cst_39 = arith.constant dense<0.000000e+00> : vector<8xf32>
    %122 = vector.multi_reduction <add>, %121, %cst_39 [1] : vector<8x32xf32> to vector<8xf32>
    %123 = vector.shape_cast %122 : vector<8xf32> to vector<8x1xf32>
    %124 = math.log %123 : vector<8x1xf32>
    %125 = arith.addf %124, %118 : vector<8x1xf32>
    %126 = vector.broadcast %125 : vector<8x1xf32> to vector<8x32xf32>
    %127 = arith.subf %126, %116 : vector<8x32xf32>
    %c2_40 = arith.constant 2 : index
    %c0_41 = arith.constant 0 : index
    %c0_42 = arith.constant 0 : index
    %128 = vector.load %arg2[%c2_40, %c0_41, %c0_42] : memref<8x32x1xi32, #tpu.memory_space<vmem>>, vector<1x32x1xi32>
    %129 = vector.shape_cast %128 : vector<1x32x1xi32> to vector<32x1xi32>
    %c-1_i32_43 = arith.constant -1 : i32
    %130 = vector.broadcast %c-1_i32_43 : i32 to vector<32x1xi32>
    %131 = arith.cmpi ne, %129, %130 : vector<32x1xi32>
    %132 = arith.extui %131 : vector<32x1xi1> to vector<32x1xi32>
    %133 = arith.sitofp %132 : vector<32x1xi32> to vector<32x1xf32>
    %134 = vector.broadcast %129 : vector<32x1xi32> to vector<32x32xi32>
    %135 = arith.cmpi eq, %0, %134 : vector<32x32xi32>
    %136 = tpu.concatenate %127, %127, %127, %127 in 0 : vector<8x32xf32>, vector<8x32xf32>, vector<8x32xf32>, vector<8x32xf32> -> vector<32x32xf32>
    %cst_44 = arith.constant 0.000000e+00 : f32
    %137 = vector.broadcast %cst_44 : f32 to vector<32x32xf32>
    %138 = arith.select %135, %136, %137 : vector<32x32xi1>, vector<32x32xf32>
    %cst_45 = arith.constant dense<0.000000e+00> : vector<32xf32>
    %139 = vector.multi_reduction <add>, %138, %cst_45 [1] : vector<32x32xf32> to vector<32xf32>
    %140 = vector.shape_cast %139 : vector<32xf32> to vector<32x1xf32>
    %141 = vector.extract_strided_slice %140 {offsets = [0, 0], sizes = [8, 1], strides = [1, 1]} : vector<32x1xf32> to vector<8x1xf32>
    %cst_46 = arith.constant dense<0.000000e+00> : vector<1xf32>
    %142 = vector.multi_reduction <add>, %141, %cst_46 [0] : vector<8x1xf32> to vector<1xf32>
    %143 = vector.shape_cast %142 : vector<1xf32> to vector<1x1xf32>
    %144 = vector.extract_strided_slice %133 {offsets = [0, 0], sizes = [8, 1], strides = [1, 1]} : vector<32x1xf32> to vector<8x1xf32>
    %cst_47 = arith.constant dense<0.000000e+00> : vector<1xf32>
    %145 = vector.multi_reduction <add>, %144, %cst_47 [0] : vector<8x1xf32> to vector<1xf32>
    %146 = vector.shape_cast %145 : vector<1xf32> to vector<1x1xf32>
    %147 = arith.divf %143, %146 : vector<1x1xf32>
    %148 = vector.extract_strided_slice %140 {offsets = [8, 0], sizes = [8, 1], strides = [1, 1]} : vector<32x1xf32> to vector<8x1xf32>
    %cst_48 = arith.constant dense<0.000000e+00> : vector<1xf32>
    %149 = vector.multi_reduction <add>, %148, %cst_48 [0] : vector<8x1xf32> to vector<1xf32>
    %150 = vector.shape_cast %149 : vector<1xf32> to vector<1x1xf32>
    %151 = vector.extract_strided_slice %133 {offsets = [8, 0], sizes = [8, 1], strides = [1, 1]} : vector<32x1xf32> to vector<8x1xf32>
    %cst_49 = arith.constant dense<0.000000e+00> : vector<1xf32>
    %152 = vector.multi_reduction <add>, %151, %cst_49 [0] : vector<8x1xf32> to vector<1xf32>
    %153 = vector.shape_cast %152 : vector<1xf32> to vector<1x1xf32>
    %154 = arith.divf %150, %153 : vector<1x1xf32>
    %155 = vector.extract_strided_slice %140 {offsets = [16, 0], sizes = [8, 1], strides = [1, 1]} : vector<32x1xf32> to vector<8x1xf32>
    %cst_50 = arith.constant dense<0.000000e+00> : vector<1xf32>
    %156 = vector.multi_reduction <add>, %155, %cst_50 [0] : vector<8x1xf32> to vector<1xf32>
    %157 = vector.shape_cast %156 : vector<1xf32> to vector<1x1xf32>
    %158 = vector.extract_strided_slice %133 {offsets = [16, 0], sizes = [8, 1], strides = [1, 1]} : vector<32x1xf32> to vector<8x1xf32>
    %cst_51 = arith.constant dense<0.000000e+00> : vector<1xf32>
    %159 = vector.multi_reduction <add>, %158, %cst_51 [0] : vector<8x1xf32> to vector<1xf32>
    %160 = vector.shape_cast %159 : vector<1xf32> to vector<1x1xf32>
    %161 = arith.divf %157, %160 : vector<1x1xf32>
    %162 = vector.extract_strided_slice %140 {offsets = [24, 0], sizes = [8, 1], strides = [1, 1]} : vector<32x1xf32> to vector<8x1xf32>
    %cst_52 = arith.constant dense<0.000000e+00> : vector<1xf32>
    %163 = vector.multi_reduction <add>, %162, %cst_52 [0] : vector<8x1xf32> to vector<1xf32>
    %164 = vector.shape_cast %163 : vector<1xf32> to vector<1x1xf32>
    %165 = vector.extract_strided_slice %133 {offsets = [24, 0], sizes = [8, 1], strides = [1, 1]} : vector<32x1xf32> to vector<8x1xf32>
    %cst_53 = arith.constant dense<0.000000e+00> : vector<1xf32>
    %166 = vector.multi_reduction <add>, %165, %cst_53 [0] : vector<8x1xf32> to vector<1xf32>
    %167 = vector.shape_cast %166 : vector<1xf32> to vector<1x1xf32>
    %168 = arith.divf %164, %167 : vector<1x1xf32>
    %169 = tpu.concatenate %147, %154, %161, %168 in 1 : vector<1x1xf32>, vector<1x1xf32>, vector<1x1xf32>, vector<1x1xf32> -> vector<1x4xf32>
    %cst_54 = arith.constant dense<0x7F800000> : vector<1xf32>
    %170 = vector.multi_reduction <minimumf>, %169, %cst_54 [1] : vector<1x4xf32> to vector<1xf32>
    %171 = vector.shape_cast %170 : vector<1xf32> to vector<1x1xf32>
    %c3 = arith.constant 3 : index
    %c0_55 = arith.constant 0 : index
    %c0_56 = arith.constant 0 : index
    %172 = vector.load %arg1[%c3, %c0_55, %c0_56] : memref<8x8x32xf32, #tpu.memory_space<vmem>>, vector<1x8x32xf32>
    %173 = vector.shape_cast %172 : vector<1x8x32xf32> to vector<8x32xf32>
    %cst_57 = arith.constant dense<0xFF800000> : vector<8xf32>
    %174 = vector.multi_reduction <maximumf>, %173, %cst_57 [1] : vector<8x32xf32> to vector<8xf32>
    %175 = vector.shape_cast %174 : vector<8xf32> to vector<8x1xf32>
    %176 = vector.broadcast %175 : vector<8x1xf32> to vector<8x32xf32>
    %177 = arith.subf %173, %176 : vector<8x32xf32>
    %178 = math.exp %177 : vector<8x32xf32>
    %cst_58 = arith.constant dense<0.000000e+00> : vector<8xf32>
    %179 = vector.multi_reduction <add>, %178, %cst_58 [1] : vector<8x32xf32> to vector<8xf32>
    %180 = vector.shape_cast %179 : vector<8xf32> to vector<8x1xf32>
    %181 = math.log %180 : vector<8x1xf32>
    %182 = arith.addf %181, %175 : vector<8x1xf32>
    %183 = vector.broadcast %182 : vector<8x1xf32> to vector<8x32xf32>
    %184 = arith.subf %183, %173 : vector<8x32xf32>
    %c3_59 = arith.constant 3 : index
    %c0_60 = arith.constant 0 : index
    %c0_61 = arith.constant 0 : index
    %185 = vector.load %arg2[%c3_59, %c0_60, %c0_61] : memref<8x32x1xi32, #tpu.memory_space<vmem>>, vector<1x32x1xi32>
    %186 = vector.shape_cast %185 : vector<1x32x1xi32> to vector<32x1xi32>
    %c-1_i32_62 = arith.constant -1 : i32
    %187 = vector.broadcast %c-1_i32_62 : i32 to vector<32x1xi32>
    %188 = arith.cmpi ne, %186, %187 : vector<32x1xi32>
    %189 = arith.extui %188 : vector<32x1xi1> to vector<32x1xi32>
    %190 = arith.sitofp %189 : vector<32x1xi32> to vector<32x1xf32>
    %191 = vector.broadcast %186 : vector<32x1xi32> to vector<32x32xi32>
    %192 = arith.cmpi eq, %0, %191 : vector<32x32xi32>
    %193 = tpu.concatenate %184, %184, %184, %184 in 0 : vector<8x32xf32>, vector<8x32xf32>, vector<8x32xf32>, vector<8x32xf32> -> vector<32x32xf32>
    %cst_63 = arith.constant 0.000000e+00 : f32
    %194 = vector.broadcast %cst_63 : f32 to vector<32x32xf32>
    %195 = arith.select %192, %193, %194 : vector<32x32xi1>, vector<32x32xf32>
    %cst_64 = arith.constant dense<0.000000e+00> : vector<32xf32>
    %196 = vector.multi_reduction <add>, %195, %cst_64 [1] : vector<32x32xf32> to vector<32xf32>
    %197 = vector.shape_cast %196 : vector<32xf32> to vector<32x1xf32>
    %198 = vector.extract_strided_slice %197 {offsets = [0, 0], sizes = [8, 1], strides = [1, 1]} : vector<32x1xf32> to vector<8x1xf32>
    %cst_65 = arith.constant dense<0.000000e+00> : vector<1xf32>
    %199 = vector.multi_reduction <add>, %198, %cst_65 [0] : vector<8x1xf32> to vector<1xf32>
    %200 = vector.shape_cast %199 : vector<1xf32> to vector<1x1xf32>
    %201 = vector.extract_strided_slice %190 {offsets = [0, 0], sizes = [8, 1], strides = [1, 1]} : vector<32x1xf32> to vector<8x1xf32>
    %cst_66 = arith.constant dense<0.000000e+00> : vector<1xf32>
    %202 = vector.multi_reduction <add>, %201, %cst_66 [0] : vector<8x1xf32> to vector<1xf32>
    %203 = vector.shape_cast %202 : vector<1xf32> to vector<1x1xf32>
    %204 = arith.divf %200, %203 : vector<1x1xf32>
    %205 = vector.extract_strided_slice %197 {offsets = [8, 0], sizes = [8, 1], strides = [1, 1]} : vector<32x1xf32> to vector<8x1xf32>
    %cst_67 = arith.constant dense<0.000000e+00> : vector<1xf32>
    %206 = vector.multi_reduction <add>, %205, %cst_67 [0] : vector<8x1xf32> to vector<1xf32>
    %207 = vector.shape_cast %206 : vector<1xf32> to vector<1x1xf32>
    %208 = vector.extract_strided_slice %190 {offsets = [8, 0], sizes = [8, 1], strides = [1, 1]} : vector<32x1xf32> to vector<8x1xf32>
    %cst_68 = arith.constant dense<0.000000e+00> : vector<1xf32>
    %209 = vector.multi_reduction <add>, %208, %cst_68 [0] : vector<8x1xf32> to vector<1xf32>
    %210 = vector.shape_cast %209 : vector<1xf32> to vector<1x1xf32>
    %211 = arith.divf %207, %210 : vector<1x1xf32>
    %212 = vector.extract_strided_slice %197 {offsets = [16, 0], sizes = [8, 1], strides = [1, 1]} : vector<32x1xf32> to vector<8x1xf32>
    %cst_69 = arith.constant dense<0.000000e+00> : vector<1xf32>
    %213 = vector.multi_reduction <add>, %212, %cst_69 [0] : vector<8x1xf32> to vector<1xf32>
    %214 = vector.shape_cast %213 : vector<1xf32> to vector<1x1xf32>
    %215 = vector.extract_strided_slice %190 {offsets = [16, 0], sizes = [8, 1], strides = [1, 1]} : vector<32x1xf32> to vector<8x1xf32>
    %cst_70 = arith.constant dense<0.000000e+00> : vector<1xf32>
    %216 = vector.multi_reduction <add>, %215, %cst_70 [0] : vector<8x1xf32> to vector<1xf32>
    %217 = vector.shape_cast %216 : vector<1xf32> to vector<1x1xf32>
    %218 = arith.divf %214, %217 : vector<1x1xf32>
    %219 = vector.extract_strided_slice %197 {offsets = [24, 0], sizes = [8, 1], strides = [1, 1]} : vector<32x1xf32> to vector<8x1xf32>
    %cst_71 = arith.constant dense<0.000000e+00> : vector<1xf32>
    %220 = vector.multi_reduction <add>, %219, %cst_71 [0] : vector<8x1xf32> to vector<1xf32>
    %221 = vector.shape_cast %220 : vector<1xf32> to vector<1x1xf32>
    %222 = vector.extract_strided_slice %190 {offsets = [24, 0], sizes = [8, 1], strides = [1, 1]} : vector<32x1xf32> to vector<8x1xf32>
    %cst_72 = arith.constant dense<0.000000e+00> : vector<1xf32>
    %223 = vector.multi_reduction <add>, %222, %cst_72 [0] : vector<8x1xf32> to vector<1xf32>
    %224 = vector.shape_cast %223 : vector<1xf32> to vector<1x1xf32>
    %225 = arith.divf %221, %224 : vector<1x1xf32>
    %226 = tpu.concatenate %204, %211, %218, %225 in 1 : vector<1x1xf32>, vector<1x1xf32>, vector<1x1xf32>, vector<1x1xf32> -> vector<1x4xf32>
    %cst_73 = arith.constant dense<0x7F800000> : vector<1xf32>
    %227 = vector.multi_reduction <minimumf>, %226, %cst_73 [1] : vector<1x4xf32> to vector<1xf32>
    %228 = vector.shape_cast %227 : vector<1xf32> to vector<1x1xf32>
    %c4 = arith.constant 4 : index
    %c0_74 = arith.constant 0 : index
    %c0_75 = arith.constant 0 : index
    %229 = vector.load %arg1[%c4, %c0_74, %c0_75] : memref<8x8x32xf32, #tpu.memory_space<vmem>>, vector<1x8x32xf32>
    %230 = vector.shape_cast %229 : vector<1x8x32xf32> to vector<8x32xf32>
    %cst_76 = arith.constant dense<0xFF800000> : vector<8xf32>
    %231 = vector.multi_reduction <maximumf>, %230, %cst_76 [1] : vector<8x32xf32> to vector<8xf32>
    %232 = vector.shape_cast %231 : vector<8xf32> to vector<8x1xf32>
    %233 = vector.broadcast %232 : vector<8x1xf32> to vector<8x32xf32>
    %234 = arith.subf %230, %233 : vector<8x32xf32>
    %235 = math.exp %234 : vector<8x32xf32>
    %cst_77 = arith.constant dense<0.000000e+00> : vector<8xf32>
    %236 = vector.multi_reduction <add>, %235, %cst_77 [1] : vector<8x32xf32> to vector<8xf32>
    %237 = vector.shape_cast %236 : vector<8xf32> to vector<8x1xf32>
    %238 = math.log %237 : vector<8x1xf32>
    %239 = arith.addf %238, %232 : vector<8x1xf32>
    %240 = vector.broadcast %239 : vector<8x1xf32> to vector<8x32xf32>
    %241 = arith.subf %240, %230 : vector<8x32xf32>
    %c4_78 = arith.constant 4 : index
    %c0_79 = arith.constant 0 : index
    %c0_80 = arith.constant 0 : index
    %242 = vector.load %arg2[%c4_78, %c0_79, %c0_80] : memref<8x32x1xi32, #tpu.memory_space<vmem>>, vector<1x32x1xi32>
    %243 = vector.shape_cast %242 : vector<1x32x1xi32> to vector<32x1xi32>
    %c-1_i32_81 = arith.constant -1 : i32
    %244 = vector.broadcast %c-1_i32_81 : i32 to vector<32x1xi32>
    %245 = arith.cmpi ne, %243, %244 : vector<32x1xi32>
    %246 = arith.extui %245 : vector<32x1xi1> to vector<32x1xi32>
    %247 = arith.sitofp %246 : vector<32x1xi32> to vector<32x1xf32>
    %248 = vector.broadcast %243 : vector<32x1xi32> to vector<32x32xi32>
    %249 = arith.cmpi eq, %0, %248 : vector<32x32xi32>
    %250 = tpu.concatenate %241, %241, %241, %241 in 0 : vector<8x32xf32>, vector<8x32xf32>, vector<8x32xf32>, vector<8x32xf32> -> vector<32x32xf32>
    %cst_82 = arith.constant 0.000000e+00 : f32
    %251 = vector.broadcast %cst_82 : f32 to vector<32x32xf32>
    %252 = arith.select %249, %250, %251 : vector<32x32xi1>, vector<32x32xf32>
    %cst_83 = arith.constant dense<0.000000e+00> : vector<32xf32>
    %253 = vector.multi_reduction <add>, %252, %cst_83 [1] : vector<32x32xf32> to vector<32xf32>
    %254 = vector.shape_cast %253 : vector<32xf32> to vector<32x1xf32>
    %255 = vector.extract_strided_slice %254 {offsets = [0, 0], sizes = [8, 1], strides = [1, 1]} : vector<32x1xf32> to vector<8x1xf32>
    %cst_84 = arith.constant dense<0.000000e+00> : vector<1xf32>
    %256 = vector.multi_reduction <add>, %255, %cst_84 [0] : vector<8x1xf32> to vector<1xf32>
    %257 = vector.shape_cast %256 : vector<1xf32> to vector<1x1xf32>
    %258 = vector.extract_strided_slice %247 {offsets = [0, 0], sizes = [8, 1], strides = [1, 1]} : vector<32x1xf32> to vector<8x1xf32>
    %cst_85 = arith.constant dense<0.000000e+00> : vector<1xf32>
    %259 = vector.multi_reduction <add>, %258, %cst_85 [0] : vector<8x1xf32> to vector<1xf32>
    %260 = vector.shape_cast %259 : vector<1xf32> to vector<1x1xf32>
    %261 = arith.divf %257, %260 : vector<1x1xf32>
    %262 = vector.extract_strided_slice %254 {offsets = [8, 0], sizes = [8, 1], strides = [1, 1]} : vector<32x1xf32> to vector<8x1xf32>
    %cst_86 = arith.constant dense<0.000000e+00> : vector<1xf32>
    %263 = vector.multi_reduction <add>, %262, %cst_86 [0] : vector<8x1xf32> to vector<1xf32>
    %264 = vector.shape_cast %263 : vector<1xf32> to vector<1x1xf32>
    %265 = vector.extract_strided_slice %247 {offsets = [8, 0], sizes = [8, 1], strides = [1, 1]} : vector<32x1xf32> to vector<8x1xf32>
    %cst_87 = arith.constant dense<0.000000e+00> : vector<1xf32>
    %266 = vector.multi_reduction <add>, %265, %cst_87 [0] : vector<8x1xf32> to vector<1xf32>
    %267 = vector.shape_cast %266 : vector<1xf32> to vector<1x1xf32>
    %268 = arith.divf %264, %267 : vector<1x1xf32>
    %269 = vector.extract_strided_slice %254 {offsets = [16, 0], sizes = [8, 1], strides = [1, 1]} : vector<32x1xf32> to vector<8x1xf32>
    %cst_88 = arith.constant dense<0.000000e+00> : vector<1xf32>
    %270 = vector.multi_reduction <add>, %269, %cst_88 [0] : vector<8x1xf32> to vector<1xf32>
    %271 = vector.shape_cast %270 : vector<1xf32> to vector<1x1xf32>
    %272 = vector.extract_strided_slice %247 {offsets = [16, 0], sizes = [8, 1], strides = [1, 1]} : vector<32x1xf32> to vector<8x1xf32>
    %cst_89 = arith.constant dense<0.000000e+00> : vector<1xf32>
    %273 = vector.multi_reduction <add>, %272, %cst_89 [0] : vector<8x1xf32> to vector<1xf32>
    %274 = vector.shape_cast %273 : vector<1xf32> to vector<1x1xf32>
    %275 = arith.divf %271, %274 : vector<1x1xf32>
    %276 = vector.extract_strided_slice %254 {offsets = [24, 0], sizes = [8, 1], strides = [1, 1]} : vector<32x1xf32> to vector<8x1xf32>
    %cst_90 = arith.constant dense<0.000000e+00> : vector<1xf32>
    %277 = vector.multi_reduction <add>, %276, %cst_90 [0] : vector<8x1xf32> to vector<1xf32>
    %278 = vector.shape_cast %277 : vector<1xf32> to vector<1x1xf32>
    %279 = vector.extract_strided_slice %247 {offsets = [24, 0], sizes = [8, 1], strides = [1, 1]} : vector<32x1xf32> to vector<8x1xf32>
    %cst_91 = arith.constant dense<0.000000e+00> : vector<1xf32>
    %280 = vector.multi_reduction <add>, %279, %cst_91 [0] : vector<8x1xf32> to vector<1xf32>
    %281 = vector.shape_cast %280 : vector<1xf32> to vector<1x1xf32>
    %282 = arith.divf %278, %281 : vector<1x1xf32>
    %283 = tpu.concatenate %261, %268, %275, %282 in 1 : vector<1x1xf32>, vector<1x1xf32>, vector<1x1xf32>, vector<1x1xf32> -> vector<1x4xf32>
    %cst_92 = arith.constant dense<0x7F800000> : vector<1xf32>
    %284 = vector.multi_reduction <minimumf>, %283, %cst_92 [1] : vector<1x4xf32> to vector<1xf32>
    %285 = vector.shape_cast %284 : vector<1xf32> to vector<1x1xf32>
    %c5 = arith.constant 5 : index
    %c0_93 = arith.constant 0 : index
    %c0_94 = arith.constant 0 : index
    %286 = vector.load %arg1[%c5, %c0_93, %c0_94] : memref<8x8x32xf32, #tpu.memory_space<vmem>>, vector<1x8x32xf32>
    %287 = vector.shape_cast %286 : vector<1x8x32xf32> to vector<8x32xf32>
    %cst_95 = arith.constant dense<0xFF800000> : vector<8xf32>
    %288 = vector.multi_reduction <maximumf>, %287, %cst_95 [1] : vector<8x32xf32> to vector<8xf32>
    %289 = vector.shape_cast %288 : vector<8xf32> to vector<8x1xf32>
    %290 = vector.broadcast %289 : vector<8x1xf32> to vector<8x32xf32>
    %291 = arith.subf %287, %290 : vector<8x32xf32>
    %292 = math.exp %291 : vector<8x32xf32>
    %cst_96 = arith.constant dense<0.000000e+00> : vector<8xf32>
    %293 = vector.multi_reduction <add>, %292, %cst_96 [1] : vector<8x32xf32> to vector<8xf32>
    %294 = vector.shape_cast %293 : vector<8xf32> to vector<8x1xf32>
    %295 = math.log %294 : vector<8x1xf32>
    %296 = arith.addf %295, %289 : vector<8x1xf32>
    %297 = vector.broadcast %296 : vector<8x1xf32> to vector<8x32xf32>
    %298 = arith.subf %297, %287 : vector<8x32xf32>
    %c5_97 = arith.constant 5 : index
    %c0_98 = arith.constant 0 : index
    %c0_99 = arith.constant 0 : index
    %299 = vector.load %arg2[%c5_97, %c0_98, %c0_99] : memref<8x32x1xi32, #tpu.memory_space<vmem>>, vector<1x32x1xi32>
    %300 = vector.shape_cast %299 : vector<1x32x1xi32> to vector<32x1xi32>
    %c-1_i32_100 = arith.constant -1 : i32
    %301 = vector.broadcast %c-1_i32_100 : i32 to vector<32x1xi32>
    %302 = arith.cmpi ne, %300, %301 : vector<32x1xi32>
    %303 = arith.extui %302 : vector<32x1xi1> to vector<32x1xi32>
    %304 = arith.sitofp %303 : vector<32x1xi32> to vector<32x1xf32>
    %305 = vector.broadcast %300 : vector<32x1xi32> to vector<32x32xi32>
    %306 = arith.cmpi eq, %0, %305 : vector<32x32xi32>
    %307 = tpu.concatenate %298, %298, %298, %298 in 0 : vector<8x32xf32>, vector<8x32xf32>, vector<8x32xf32>, vector<8x32xf32> -> vector<32x32xf32>
    %cst_101 = arith.constant 0.000000e+00 : f32
    %308 = vector.broadcast %cst_101 : f32 to vector<32x32xf32>
    %309 = arith.select %306, %307, %308 : vector<32x32xi1>, vector<32x32xf32>
    %cst_102 = arith.constant dense<0.000000e+00> : vector<32xf32>
    %310 = vector.multi_reduction <add>, %309, %cst_102 [1] : vector<32x32xf32> to vector<32xf32>
    %311 = vector.shape_cast %310 : vector<32xf32> to vector<32x1xf32>
    %312 = vector.extract_strided_slice %311 {offsets = [0, 0], sizes = [8, 1], strides = [1, 1]} : vector<32x1xf32> to vector<8x1xf32>
    %cst_103 = arith.constant dense<0.000000e+00> : vector<1xf32>
    %313 = vector.multi_reduction <add>, %312, %cst_103 [0] : vector<8x1xf32> to vector<1xf32>
    %314 = vector.shape_cast %313 : vector<1xf32> to vector<1x1xf32>
    %315 = vector.extract_strided_slice %304 {offsets = [0, 0], sizes = [8, 1], strides = [1, 1]} : vector<32x1xf32> to vector<8x1xf32>
    %cst_104 = arith.constant dense<0.000000e+00> : vector<1xf32>
    %316 = vector.multi_reduction <add>, %315, %cst_104 [0] : vector<8x1xf32> to vector<1xf32>
    %317 = vector.shape_cast %316 : vector<1xf32> to vector<1x1xf32>
    %318 = arith.divf %314, %317 : vector<1x1xf32>
    %319 = vector.extract_strided_slice %311 {offsets = [8, 0], sizes = [8, 1], strides = [1, 1]} : vector<32x1xf32> to vector<8x1xf32>
    %cst_105 = arith.constant dense<0.000000e+00> : vector<1xf32>
    %320 = vector.multi_reduction <add>, %319, %cst_105 [0] : vector<8x1xf32> to vector<1xf32>
    %321 = vector.shape_cast %320 : vector<1xf32> to vector<1x1xf32>
    %322 = vector.extract_strided_slice %304 {offsets = [8, 0], sizes = [8, 1], strides = [1, 1]} : vector<32x1xf32> to vector<8x1xf32>
    %cst_106 = arith.constant dense<0.000000e+00> : vector<1xf32>
    %323 = vector.multi_reduction <add>, %322, %cst_106 [0] : vector<8x1xf32> to vector<1xf32>
    %324 = vector.shape_cast %323 : vector<1xf32> to vector<1x1xf32>
    %325 = arith.divf %321, %324 : vector<1x1xf32>
    %326 = vector.extract_strided_slice %311 {offsets = [16, 0], sizes = [8, 1], strides = [1, 1]} : vector<32x1xf32> to vector<8x1xf32>
    %cst_107 = arith.constant dense<0.000000e+00> : vector<1xf32>
    %327 = vector.multi_reduction <add>, %326, %cst_107 [0] : vector<8x1xf32> to vector<1xf32>
    %328 = vector.shape_cast %327 : vector<1xf32> to vector<1x1xf32>
    %329 = vector.extract_strided_slice %304 {offsets = [16, 0], sizes = [8, 1], strides = [1, 1]} : vector<32x1xf32> to vector<8x1xf32>
    %cst_108 = arith.constant dense<0.000000e+00> : vector<1xf32>
    %330 = vector.multi_reduction <add>, %329, %cst_108 [0] : vector<8x1xf32> to vector<1xf32>
    %331 = vector.shape_cast %330 : vector<1xf32> to vector<1x1xf32>
    %332 = arith.divf %328, %331 : vector<1x1xf32>
    %333 = vector.extract_strided_slice %311 {offsets = [24, 0], sizes = [8, 1], strides = [1, 1]} : vector<32x1xf32> to vector<8x1xf32>
    %cst_109 = arith.constant dense<0.000000e+00> : vector<1xf32>
    %334 = vector.multi_reduction <add>, %333, %cst_109 [0] : vector<8x1xf32> to vector<1xf32>
    %335 = vector.shape_cast %334 : vector<1xf32> to vector<1x1xf32>
    %336 = vector.extract_strided_slice %304 {offsets = [24, 0], sizes = [8, 1], strides = [1, 1]} : vector<32x1xf32> to vector<8x1xf32>
    %cst_110 = arith.constant dense<0.000000e+00> : vector<1xf32>
    %337 = vector.multi_reduction <add>, %336, %cst_110 [0] : vector<8x1xf32> to vector<1xf32>
    %338 = vector.shape_cast %337 : vector<1xf32> to vector<1x1xf32>
    %339 = arith.divf %335, %338 : vector<1x1xf32>
    %340 = tpu.concatenate %318, %325, %332, %339 in 1 : vector<1x1xf32>, vector<1x1xf32>, vector<1x1xf32>, vector<1x1xf32> -> vector<1x4xf32>
    %cst_111 = arith.constant dense<0x7F800000> : vector<1xf32>
    %341 = vector.multi_reduction <minimumf>, %340, %cst_111 [1] : vector<1x4xf32> to vector<1xf32>
    %342 = vector.shape_cast %341 : vector<1xf32> to vector<1x1xf32>
    %c6 = arith.constant 6 : index
    %c0_112 = arith.constant 0 : index
    %c0_113 = arith.constant 0 : index
    %343 = vector.load %arg1[%c6, %c0_112, %c0_113] : memref<8x8x32xf32, #tpu.memory_space<vmem>>, vector<1x8x32xf32>
    %344 = vector.shape_cast %343 : vector<1x8x32xf32> to vector<8x32xf32>
    %cst_114 = arith.constant dense<0xFF800000> : vector<8xf32>
    %345 = vector.multi_reduction <maximumf>, %344, %cst_114 [1] : vector<8x32xf32> to vector<8xf32>
    %346 = vector.shape_cast %345 : vector<8xf32> to vector<8x1xf32>
    %347 = vector.broadcast %346 : vector<8x1xf32> to vector<8x32xf32>
    %348 = arith.subf %344, %347 : vector<8x32xf32>
    %349 = math.exp %348 : vector<8x32xf32>
    %cst_115 = arith.constant dense<0.000000e+00> : vector<8xf32>
    %350 = vector.multi_reduction <add>, %349, %cst_115 [1] : vector<8x32xf32> to vector<8xf32>
    %351 = vector.shape_cast %350 : vector<8xf32> to vector<8x1xf32>
    %352 = math.log %351 : vector<8x1xf32>
    %353 = arith.addf %352, %346 : vector<8x1xf32>
    %354 = vector.broadcast %353 : vector<8x1xf32> to vector<8x32xf32>
    %355 = arith.subf %354, %344 : vector<8x32xf32>
    %c6_116 = arith.constant 6 : index
    %c0_117 = arith.constant 0 : index
    %c0_118 = arith.constant 0 : index
    %356 = vector.load %arg2[%c6_116, %c0_117, %c0_118] : memref<8x32x1xi32, #tpu.memory_space<vmem>>, vector<1x32x1xi32>
    %357 = vector.shape_cast %356 : vector<1x32x1xi32> to vector<32x1xi32>
    %c-1_i32_119 = arith.constant -1 : i32
    %358 = vector.broadcast %c-1_i32_119 : i32 to vector<32x1xi32>
    %359 = arith.cmpi ne, %357, %358 : vector<32x1xi32>
    %360 = arith.extui %359 : vector<32x1xi1> to vector<32x1xi32>
    %361 = arith.sitofp %360 : vector<32x1xi32> to vector<32x1xf32>
    %362 = vector.broadcast %357 : vector<32x1xi32> to vector<32x32xi32>
    %363 = arith.cmpi eq, %0, %362 : vector<32x32xi32>
    %364 = tpu.concatenate %355, %355, %355, %355 in 0 : vector<8x32xf32>, vector<8x32xf32>, vector<8x32xf32>, vector<8x32xf32> -> vector<32x32xf32>
    %cst_120 = arith.constant 0.000000e+00 : f32
    %365 = vector.broadcast %cst_120 : f32 to vector<32x32xf32>
    %366 = arith.select %363, %364, %365 : vector<32x32xi1>, vector<32x32xf32>
    %cst_121 = arith.constant dense<0.000000e+00> : vector<32xf32>
    %367 = vector.multi_reduction <add>, %366, %cst_121 [1] : vector<32x32xf32> to vector<32xf32>
    %368 = vector.shape_cast %367 : vector<32xf32> to vector<32x1xf32>
    %369 = vector.extract_strided_slice %368 {offsets = [0, 0], sizes = [8, 1], strides = [1, 1]} : vector<32x1xf32> to vector<8x1xf32>
    %cst_122 = arith.constant dense<0.000000e+00> : vector<1xf32>
    %370 = vector.multi_reduction <add>, %369, %cst_122 [0] : vector<8x1xf32> to vector<1xf32>
    %371 = vector.shape_cast %370 : vector<1xf32> to vector<1x1xf32>
    %372 = vector.extract_strided_slice %361 {offsets = [0, 0], sizes = [8, 1], strides = [1, 1]} : vector<32x1xf32> to vector<8x1xf32>
    %cst_123 = arith.constant dense<0.000000e+00> : vector<1xf32>
    %373 = vector.multi_reduction <add>, %372, %cst_123 [0] : vector<8x1xf32> to vector<1xf32>
    %374 = vector.shape_cast %373 : vector<1xf32> to vector<1x1xf32>
    %375 = arith.divf %371, %374 : vector<1x1xf32>
    %376 = vector.extract_strided_slice %368 {offsets = [8, 0], sizes = [8, 1], strides = [1, 1]} : vector<32x1xf32> to vector<8x1xf32>
    %cst_124 = arith.constant dense<0.000000e+00> : vector<1xf32>
    %377 = vector.multi_reduction <add>, %376, %cst_124 [0] : vector<8x1xf32> to vector<1xf32>
    %378 = vector.shape_cast %377 : vector<1xf32> to vector<1x1xf32>
    %379 = vector.extract_strided_slice %361 {offsets = [8, 0], sizes = [8, 1], strides = [1, 1]} : vector<32x1xf32> to vector<8x1xf32>
    %cst_125 = arith.constant dense<0.000000e+00> : vector<1xf32>
    %380 = vector.multi_reduction <add>, %379, %cst_125 [0] : vector<8x1xf32> to vector<1xf32>
    %381 = vector.shape_cast %380 : vector<1xf32> to vector<1x1xf32>
    %382 = arith.divf %378, %381 : vector<1x1xf32>
    %383 = vector.extract_strided_slice %368 {offsets = [16, 0], sizes = [8, 1], strides = [1, 1]} : vector<32x1xf32> to vector<8x1xf32>
    %cst_126 = arith.constant dense<0.000000e+00> : vector<1xf32>
    %384 = vector.multi_reduction <add>, %383, %cst_126 [0] : vector<8x1xf32> to vector<1xf32>
    %385 = vector.shape_cast %384 : vector<1xf32> to vector<1x1xf32>
    %386 = vector.extract_strided_slice %361 {offsets = [16, 0], sizes = [8, 1], strides = [1, 1]} : vector<32x1xf32> to vector<8x1xf32>
    %cst_127 = arith.constant dense<0.000000e+00> : vector<1xf32>
    %387 = vector.multi_reduction <add>, %386, %cst_127 [0] : vector<8x1xf32> to vector<1xf32>
    %388 = vector.shape_cast %387 : vector<1xf32> to vector<1x1xf32>
    %389 = arith.divf %385, %388 : vector<1x1xf32>
    %390 = vector.extract_strided_slice %368 {offsets = [24, 0], sizes = [8, 1], strides = [1, 1]} : vector<32x1xf32> to vector<8x1xf32>
    %cst_128 = arith.constant dense<0.000000e+00> : vector<1xf32>
    %391 = vector.multi_reduction <add>, %390, %cst_128 [0] : vector<8x1xf32> to vector<1xf32>
    %392 = vector.shape_cast %391 : vector<1xf32> to vector<1x1xf32>
    %393 = vector.extract_strided_slice %361 {offsets = [24, 0], sizes = [8, 1], strides = [1, 1]} : vector<32x1xf32> to vector<8x1xf32>
    %cst_129 = arith.constant dense<0.000000e+00> : vector<1xf32>
    %394 = vector.multi_reduction <add>, %393, %cst_129 [0] : vector<8x1xf32> to vector<1xf32>
    %395 = vector.shape_cast %394 : vector<1xf32> to vector<1x1xf32>
    %396 = arith.divf %392, %395 : vector<1x1xf32>
    %397 = tpu.concatenate %375, %382, %389, %396 in 1 : vector<1x1xf32>, vector<1x1xf32>, vector<1x1xf32>, vector<1x1xf32> -> vector<1x4xf32>
    %cst_130 = arith.constant dense<0x7F800000> : vector<1xf32>
    %398 = vector.multi_reduction <minimumf>, %397, %cst_130 [1] : vector<1x4xf32> to vector<1xf32>
    %399 = vector.shape_cast %398 : vector<1xf32> to vector<1x1xf32>
    %c7 = arith.constant 7 : index
    %c0_131 = arith.constant 0 : index
    %c0_132 = arith.constant 0 : index
    %400 = vector.load %arg1[%c7, %c0_131, %c0_132] : memref<8x8x32xf32, #tpu.memory_space<vmem>>, vector<1x8x32xf32>
    %401 = vector.shape_cast %400 : vector<1x8x32xf32> to vector<8x32xf32>
    %cst_133 = arith.constant dense<0xFF800000> : vector<8xf32>
    %402 = vector.multi_reduction <maximumf>, %401, %cst_133 [1] : vector<8x32xf32> to vector<8xf32>
    %403 = vector.shape_cast %402 : vector<8xf32> to vector<8x1xf32>
    %404 = vector.broadcast %403 : vector<8x1xf32> to vector<8x32xf32>
    %405 = arith.subf %401, %404 : vector<8x32xf32>
    %406 = math.exp %405 : vector<8x32xf32>
    %cst_134 = arith.constant dense<0.000000e+00> : vector<8xf32>
    %407 = vector.multi_reduction <add>, %406, %cst_134 [1] : vector<8x32xf32> to vector<8xf32>
    %408 = vector.shape_cast %407 : vector<8xf32> to vector<8x1xf32>
    %409 = math.log %408 : vector<8x1xf32>
    %410 = arith.addf %409, %403 : vector<8x1xf32>
    %411 = vector.broadcast %410 : vector<8x1xf32> to vector<8x32xf32>
    %412 = arith.subf %411, %401 : vector<8x32xf32>
    %c7_135 = arith.constant 7 : index
    %c0_136 = arith.constant 0 : index
    %c0_137 = arith.constant 0 : index
    %413 = vector.load %arg2[%c7_135, %c0_136, %c0_137] : memref<8x32x1xi32, #tpu.memory_space<vmem>>, vector<1x32x1xi32>
    %414 = vector.shape_cast %413 : vector<1x32x1xi32> to vector<32x1xi32>
    %c-1_i32_138 = arith.constant -1 : i32
    %415 = vector.broadcast %c-1_i32_138 : i32 to vector<32x1xi32>
    %416 = arith.cmpi ne, %414, %415 : vector<32x1xi32>
    %417 = arith.extui %416 : vector<32x1xi1> to vector<32x1xi32>
    %418 = arith.sitofp %417 : vector<32x1xi32> to vector<32x1xf32>
    %419 = vector.broadcast %414 : vector<32x1xi32> to vector<32x32xi32>
    %420 = arith.cmpi eq, %0, %419 : vector<32x32xi32>
    %421 = tpu.concatenate %412, %412, %412, %412 in 0 : vector<8x32xf32>, vector<8x32xf32>, vector<8x32xf32>, vector<8x32xf32> -> vector<32x32xf32>
    %cst_139 = arith.constant 0.000000e+00 : f32
    %422 = vector.broadcast %cst_139 : f32 to vector<32x32xf32>
    %423 = arith.select %420, %421, %422 : vector<32x32xi1>, vector<32x32xf32>
    %cst_140 = arith.constant dense<0.000000e+00> : vector<32xf32>
    %424 = vector.multi_reduction <add>, %423, %cst_140 [1] : vector<32x32xf32> to vector<32xf32>
    %425 = vector.shape_cast %424 : vector<32xf32> to vector<32x1xf32>
    %426 = vector.extract_strided_slice %425 {offsets = [0, 0], sizes = [8, 1], strides = [1, 1]} : vector<32x1xf32> to vector<8x1xf32>
    %cst_141 = arith.constant dense<0.000000e+00> : vector<1xf32>
    %427 = vector.multi_reduction <add>, %426, %cst_141 [0] : vector<8x1xf32> to vector<1xf32>
    %428 = vector.shape_cast %427 : vector<1xf32> to vector<1x1xf32>
    %429 = vector.extract_strided_slice %418 {offsets = [0, 0], sizes = [8, 1], strides = [1, 1]} : vector<32x1xf32> to vector<8x1xf32>
    %cst_142 = arith.constant dense<0.000000e+00> : vector<1xf32>
    %430 = vector.multi_reduction <add>, %429, %cst_142 [0] : vector<8x1xf32> to vector<1xf32>
    %431 = vector.shape_cast %430 : vector<1xf32> to vector<1x1xf32>
    %432 = arith.divf %428, %431 : vector<1x1xf32>
    %433 = vector.extract_strided_slice %425 {offsets = [8, 0], sizes = [8, 1], strides = [1, 1]} : vector<32x1xf32> to vector<8x1xf32>
    %cst_143 = arith.constant dense<0.000000e+00> : vector<1xf32>
    %434 = vector.multi_reduction <add>, %433, %cst_143 [0] : vector<8x1xf32> to vector<1xf32>
    %435 = vector.shape_cast %434 : vector<1xf32> to vector<1x1xf32>
    %436 = vector.extract_strided_slice %418 {offsets = [8, 0], sizes = [8, 1], strides = [1, 1]} : vector<32x1xf32> to vector<8x1xf32>
    %cst_144 = arith.constant dense<0.000000e+00> : vector<1xf32>
    %437 = vector.multi_reduction <add>, %436, %cst_144 [0] : vector<8x1xf32> to vector<1xf32>
    %438 = vector.shape_cast %437 : vector<1xf32> to vector<1x1xf32>
    %439 = arith.divf %435, %438 : vector<1x1xf32>
    %440 = vector.extract_strided_slice %425 {offsets = [16, 0], sizes = [8, 1], strides = [1, 1]} : vector<32x1xf32> to vector<8x1xf32>
    %cst_145 = arith.constant dense<0.000000e+00> : vector<1xf32>
    %441 = vector.multi_reduction <add>, %440, %cst_145 [0] : vector<8x1xf32> to vector<1xf32>
    %442 = vector.shape_cast %441 : vector<1xf32> to vector<1x1xf32>
    %443 = vector.extract_strided_slice %418 {offsets = [16, 0], sizes = [8, 1], strides = [1, 1]} : vector<32x1xf32> to vector<8x1xf32>
    %cst_146 = arith.constant dense<0.000000e+00> : vector<1xf32>
    %444 = vector.multi_reduction <add>, %443, %cst_146 [0] : vector<8x1xf32> to vector<1xf32>
    %445 = vector.shape_cast %444 : vector<1xf32> to vector<1x1xf32>
    %446 = arith.divf %442, %445 : vector<1x1xf32>
    %447 = vector.extract_strided_slice %425 {offsets = [24, 0], sizes = [8, 1], strides = [1, 1]} : vector<32x1xf32> to vector<8x1xf32>
    %cst_147 = arith.constant dense<0.000000e+00> : vector<1xf32>
    %448 = vector.multi_reduction <add>, %447, %cst_147 [0] : vector<8x1xf32> to vector<1xf32>
    %449 = vector.shape_cast %448 : vector<1xf32> to vector<1x1xf32>
    %450 = vector.extract_strided_slice %418 {offsets = [24, 0], sizes = [8, 1], strides = [1, 1]} : vector<32x1xf32> to vector<8x1xf32>
    %cst_148 = arith.constant dense<0.000000e+00> : vector<1xf32>
    %451 = vector.multi_reduction <add>, %450, %cst_148 [0] : vector<8x1xf32> to vector<1xf32>
    %452 = vector.shape_cast %451 : vector<1xf32> to vector<1x1xf32>
    %453 = arith.divf %449, %452 : vector<1x1xf32>
    %454 = tpu.concatenate %432, %439, %446, %453 in 1 : vector<1x1xf32>, vector<1x1xf32>, vector<1x1xf32>, vector<1x1xf32> -> vector<1x4xf32>
    %cst_149 = arith.constant dense<0x7F800000> : vector<1xf32>
    %455 = vector.multi_reduction <minimumf>, %454, %cst_149 [1] : vector<1x4xf32> to vector<1xf32>
    %456 = vector.shape_cast %455 : vector<1xf32> to vector<1x1xf32>
    %457 = tpu.concatenate %57, %114, %171, %228, %285, %342, %399, %456 in 1 : vector<1x1xf32>, vector<1x1xf32>, vector<1x1xf32>, vector<1x1xf32>, vector<1x1xf32>, vector<1x1xf32>, vector<1x1xf32>, vector<1x1xf32> -> vector<1x8xf32>
    %c0_150 = arith.constant 0 : index
    %c0_151 = arith.constant 0 : index
    %c0_152 = arith.constant 0 : index
    %458 = vector.load %arg3[%c0_150, %c0_151, %c0_152] : memref<1x1x8xf32, #tpu.memory_space<vmem>>, vector<1x1x8xf32>
    %459 = vector.shape_cast %458 : vector<1x1x8xf32> to vector<1x8xf32>
    %460 = vector.shape_cast %457 : vector<1x8xf32> to vector<1x1x8xf32>
    tpu.vector_store %arg3[%c0_150, %c0_151, %c0_152], %460 {strides = array<i32>} : memref<1x1x8xf32, #tpu.memory_space<vmem>>, vector<1x1x8xf32>,
    return
  }
  func.func @transform_0(%arg0: i32) -> (i32, i32, i32) {
    %c0_i32 = arith.constant 0 : i32
    %c0_i32_0 = arith.constant 0 : i32
    %c0_i32_1 = arith.constant 0 : i32
    return %arg0, %c0_i32, %c0_i32_0 : i32, i32, i32
  }
  func.func @transform_1(%arg0: i32) -> (i32, i32, i32) {
    %c0_i32 = arith.constant 0 : i32
    %c0_i32_0 = arith.constant 0 : i32
    %c0_i32_1 = arith.constant 0 : i32
    return %arg0, %c0_i32, %c0_i32_0 : i32, i32, i32
  }
  func.func @transform_2(%arg0: i32) -> (i32, i32, i32) {
    %c0_i32 = arith.constant 0 : i32
    %c0_i32_0 = arith.constant 0 : i32
    %c0_i32_1 = arith.constant 0 : i32
    return %arg0, %c0_i32, %c0_i32_0 : i32, i32, i32
  }
}

</mosaic_0001>

<bundles_post_ra>
// kernel: tpu_custom_call.1
= control target key start
LH: loop header
LB: loop body
LE: loop exit
PB: predicated region body
PF: predicated region fallthrough
CT: control target
= control target key end

     0   :  { %7 = vsyncpa [#allocation3], 0  ;;  %s2409_s0 = inlined_call_operand.vmem [shape: f32[16,8,32], index: 0, kind: input, shape index: {}]   ;;  %s2410_s1 = inlined_call_operand.vmem [shape: s32[16,32,1], index: 1, kind: input, shape index: {}]   ;;  %s2411_s2 = inlined_call_operand.hbm [shape: f32[2,1,8], index: 2, kind: output, shape index: {}]  }
   0x1   :  { %9 = vsyncpa [#allocation3 + $0x1], 0  ;;  %s1713_s9 = smov 0   ;;  %s1715_s10 = smov 0  }
   0x2   :  { %s1717_s11 = smov 0   ;;  %s1719_s12 = smov 0  }
   0x3 LB: > { %s1734_s13 = sadd.s32 4294967295, %s1690_s12   ;;  %s1402_s14 = sadd.s32 4294967294, %s1690_s12   ;;  %s1690_s12 = sphi %s1719_s12, %s2417_s12   ;;  %s1686_s11 = sphi %s1717_s11, %s2416_s11   ;;  %s1682_s10 = sphi %s1715_s10, %s2415_s10   ;;  %s1678_s9 = sphi %s1713_s9, %s2414_s9  }
   0x4   : > { %s1738_s15 = sadd.s32 1, %s1690_s12   ;;  %s74_s16 = sadd.s32 1, %s1686_s11 }
   0x5   : > { %s71_s17 = ssub.s32 %s1690_s12, %s1738_s15  ;;  %p84_p0 = scmp.ne.s32.totalorder %s1686_s11, %s1682_s10 }
   0x6   : > { %p72_p1 = scmp.eq.s32.totalorder %s71_s17, 0  ;;  %p85_p2 = scmp.eq.s32.totalorder %s1734_s13, 1 }
   0x7   : > { %p90_p3 = scmp.ne.s32.totalorder %s1682_s10, %s1678_s9  ;;  %p91_p4 = scmp.eq.s32.totalorder %s1402_s14, 1 }
   0x8   : > { %s1749_s18 = scalar_select %p72_p1, %s1686_s11, %s74_s16  }
   0x9   : > { %p1751_p5 = por %p85_p2, %p84_p0  ;;  %p1755_p6 = por %p91_p4, %p90_p3 }
   0xa   : > { %p1405_p7 = scmp.ge.s32.totalorder %s1690_s12, 1  ;;  %p128_p8 = scmp.lt.s32.totalorder %s1690_s12, 3 }
   0xc   : > { %p129_p9 = pnand %p1405_p7, %p128_p8 }
   0xd   : > { %s1406_s21 = sshll.u32 (!%p129_p9), %s1734_s13, 3  ;;  %v1692_v0 = vmov (!%p129_p9), 0   ;;  %vm171_vm0 = vcmask (!%p129_p9), 261120   ;;  %s1694_s30 = smov (!%p129_p9), 1  }
   0xe   : > { %132 = sbr.rel (%p129_p9) target bundleno = 1404 (0x57c), region = 28  ;;  %p156_p10 = scmp.lt.s32.totalorder (!%p129_p9), %s1406_s21, 15  ;;  %1526 = vset.pattern.permute.xlu0 (!%p129_p9), %v1692_v0  ;;  %1527 = vset.pattern.permute.xlu1 (!%p129_p9), %v1692_v0 }
   0xf   : > { %s1695_s3 = smov (!%p129_p9), 2   ;;  %s1696_s4 = smov (!%p129_p9), 3  }
  0x10   : > { %s153_s5 = sand.u32 (!%p129_p9), 1, %s1682_s10   ;;  %s1478_s6 = sshll.u32 (!%p129_p9), %s1734_s13, 4 }
  0x11   : > { %s154_s7 = scalar_lea.vmem (!%p129_p9), [#allocation2], %s153_s5  ;;  %s2367_s17 = scalar_lea.hbm (!%p129_p9), %s2411_s2, %s1478_s6 }
  0x12   : > { %s1335_s8 = sshll.u32 (!%p129_p9), %s154_s7, 4  ;;  %s1323_s13 = scalar_lea.sflag (!%p129_p9), [#allocation3], %s153_s5  ;;  %s2369_s8 = int_to_ptr.vmem [resolvable:$true] %s1335_s8 }
  0x15   : > { %s2419_s21 = smov (!%p156_p10, %s1406_s21), 15 }
  0x16   : > { %s1407_s22 = sshll.u32 %s2419_s21, 3  ;;  %s1481_s26 = sshll.u32 %s2419_s21, 5 }
  0x17   : > { %s1765_s25 = scalar_lea.vmem %s2409_s0, %s1407_s22  ;;  %s1790_s29 = scalar_lea.vmem %s2410_s1, %s1481_s26 }
  0x18   : > { %v1768_v1 = vld [vmem:[%s1765_s25] sm:$0xff]  ;;  %v1771_v2 = vld [vmem:[%s1765_s25 + $0x8] sm:$0xff]  ;;  %v1774_v3 = vld [vmem:[%s1765_s25 + $0x10] sm:$0xff]  ;;  %s1628_s21 = scalar_lea.vmem %s2369_s8, 16  ;;  %s1697_s22 = smov [#allocation2]  }
  0x19   : > { %v172_v4 = vsel %vm171_vm0, %v1768_v1, -inf  ;;  %v459_v5 = vsel %vm171_vm0, %v1774_v3, -inf  ;;  %v1781_v6 = vld [vmem:[%s1765_s25 + $0x18] sm:$0xff]  ;;  %v317_v7 = vsel %vm171_vm0, %v1771_v2, -inf  ;;  %v1793_v9 = vld [vmem:[%s1790_s29 + $0x10] sm:$0xff]  ;;  %v1797_v10 = vld [vmem:[%s1790_s29 + $0x20] sm:$0xff]  ;;  %p1629_p11 = scmp.ne.s32.totalorder %s2369_s8, %s1628_s21 }
  0x1a   : > { %173 = vmax.xlane.f32.xlu0 %v172_v4  ;;  %460 = vmax.xlane.f32.xlu1 %v459_v5  ;;  %v601_v8 = vsel %vm171_vm0, %v1781_v6, -inf  ;;  %v1801_v11 = vld [vmem:[%s1790_s29] sm:$0xff]  ;;  %v1804_v12 = vld [vmem:[%s1790_s29 + $0x28] sm:$0xff]  ;;  %v1812_v14 = vld [vmem:[%s1790_s29 + $0x30] sm:$0xff]  ;;  %s1632_s23 = sshll.u32 %s1697_s22, 4  ;;  %s1633_s23 = int_to_ptr.vmem [resolvable:$false] %s1632_s23 }
  0x1b   : > { %v1809_v13 = vld [vmem:[%s1790_s29 + $0x8] sm:$0xff]  ;;  %v1817_v15 = vld [vmem:[%s1790_s29 + $0x18] sm:$0xff]  ;;  %v1820_v16 = vld [vmem:[%s1790_s29 + $0x40] sm:$0xff]  ;;  %p1630_p12 = pnand %p1629_p11, %p1751_p5  ;;  %s1634_s24 = scalar_lea.vmem %s1633_s23, 32 }
  0x1c   : > { %v1825_v17 = vld [vmem:[%s1790_s29 + $0x38] sm:$0xff]  ;;  %v1832_v19 = vld [vmem:[%s1790_s29 + $0x48] sm:$0xff]  ;;  %v1836_v20 = vld [vmem:[%s1790_s29 + $0x60] sm:$0xff]  ;;  %p1635_p0 = scmp.lt.s32.totalorder %s2369_s8, %s1633_s23  ;;  %p1636_p1 = scmp.lt.s32.totalorder %s1634_s24, %s1628_s21 }
  0x1d   : > { %v1828_v18 = vld [vmem:[%s1790_s29 + $0x58] sm:$0xff]  ;;  %v1840_v21 = vld [vmem:[%s1790_s29 + $0x50] sm:$0xff]  ;;  %v1848_v23 = vld [vmem:[%s1790_s29 + $0x68] sm:$0xff]  ;;  %p1631_p13 = pneg %p1630_p12 }
  0x1e   : > { %318 = vmax.xlane.f32.xlu0 %v317_v7  ;;  %602 = vmax.xlane.f32.xlu1 %v601_v8  ;;  %v1844_v22 = vld [vmem:[%s1790_s29 + $0x78] sm:$0xff]  ;;  %v1853_v24 = vld [vmem:[%s1790_s29 + $0x70] sm:$0xff]  ;;  %v1877_v45 = vld [vmem:[%s1765_s25 + $0x20] sm:$0xff]  ;;  %v168_v7 = vlaneseq  ;;  %p1637_p2 = por %p1636_p1, %p1635_p0 }
  0x1f   : > { %v743_v46 = vsel %vm171_vm0, %v1877_v45, -inf  ;;  %v1882_v47 = vld [vmem:[%s1765_s25 + $0x28] sm:$0xff]  ;;  %v1887_v49 = vld [vmem:[%s1765_s25 + $0x30] sm:$0xff]  ;;  %v1890_v50 = vld [vmem:[%s1765_s25 + $0x38] sm:$0xff] }
  0x20   : > { %v885_v48 = vsel %vm171_vm0, %v1882_v47, -inf  ;;  %v1027_v51 = vsel %vm171_vm0, %v1887_v49, -inf  ;;  %v1169_v52 = vsel %vm171_vm0, %v1890_v50, -inf  ;;  %p1638_p3 = pnand %p1637_p2, %p1631_p13 }
  0x2f   : > { %202 = vperm.xlu1 %1527, %v1801_v11  }
  0x33   : > { %205 = vperm.xlu1 %1527, %v1809_v13  }
  0x34   : > { %208 = vperm.xlu0 %1526, %v1793_v9  }
  0x37   : > { %211 = vperm.xlu1 %1527, %v1817_v15  }
  0x38   : > { %348 = vperm.xlu0 %1526, %v1797_v10  }
  0x3b   : > { %357 = vperm.xlu1 %1527, %v1825_v17  }
  0x3c   : > { %351 = vperm.xlu0 %1526, %v1804_v12  }
  0x3f   : > { %493 = vperm.xlu1 %1527, %v1832_v19  }
  0x40   : > { %354 = vperm.xlu0 %1526, %v1812_v14  }
  0x43   : > { %496 = vperm.xlu1 %1527, %v1840_v21  }
  0x44   : > { %490 = vperm.xlu0 %1526, %v1820_v16  }
  0x47   : > { %635 = vperm.xlu1 %1527, %v1848_v23  }
  0x48   : > { %499 = vperm.xlu0 %1526, %v1828_v18  }
  0x4b   : > { %638 = vperm.xlu1 %1527, %v1853_v24  }
  0x4c   : > { %632 = vperm.xlu0 %1526, %v1836_v20  }
  0x50   : > { %641 = vperm.xlu0 %1526, %v1844_v22  }
  0x6f   : > { %1028 = vmax.xlane.f32.xlu1 %v1027_v51 }
  0xa7   : > { %v1856_v25 = vpop.xlane.xlu0 %173  ;;  %v1858_v26 = vpop.xlane.xlu1 %460 }
  0xa8   : > { %v175_v27 = vsub.f32 %v1768_v1, %v1856_v25  ;;  %v462_v28 = vsub.f32 %v1774_v3, %v1858_v26 }
  0xaa   : > { %v176_v29 = vmul.f32 1.442695, %v175_v27  ;;  %v463_v31 = vmul.f32 1.442695, %v462_v28 }
  0xab   : > { %v1864_v30 = vpop.xlane.xlu0 %318  ;;  %v1866_v32 = vpop.xlane.xlu1 %602 }
  0xac   : > { %1528 = vpow2.f32 %v176_v29  ;;  %v320_v33 = vsub.f32 %v1771_v2, %v1864_v30  ;;  %v604_v34 = vsub.f32 %v1781_v6, %v1866_v32 }
  0xad   : > { %1530 = vpow2.f32 %v463_v31  ;;  %v1906_v31 = vand.u32 127, %v168_v7 }
  0xae   : > { %v321_v35 = vmul.f32 1.442695, %v320_v33  ;;  %v605_v36 = vmul.f32 1.442695, %v604_v34 }
  0xaf   : > { %v203_v60 = vpop.permute.xlu1 %202 }
  0xb0   : > { %1532 = vpow2.f32 %v321_v35  ;;  %vm213_vm1 = vcmp.eq.s32.totalorder %v1906_v31, %v203_v60 }
  0xb1   : > { %1534 = vpow2.f32 %v605_v36 }
  0xb3   : > { %v209_v53 = vpop.permute.xlu0 %208  ;;  %v206_v62 = vpop.permute.xlu1 %205 }
  0xb4   : > { %vm215_vm2 = vcmp.eq.s32.totalorder %v1906_v31, %v209_v53  ;;  %vm214_vm3 = vcmp.eq.s32.totalorder %v1906_v31, %v206_v62 }
  0xb6   : > { %v1529_v37 = vpop.eup %1528 }
  0xb7   : > { %v178_v38 = vsel %vm171_vm0, %v1529_v37, 0.0  ;;  %v1531_v39 = vpop.eup %1530  ;;  %v349_v54 = vpop.permute.xlu0 %348 }
  0xb8   : > { %179 = vadd.xlane.f32.xlu0 %v178_v38  ;;  %v465_v42 = vsel %vm171_vm0, %v1531_v39, 0.0  ;;  %v212_v4 = vpop.permute.xlu1 %211  ;;  %vm359_vm4 = vcmp.eq.s32.totalorder %v1906_v31, %v349_v54 }
  0xb9   : > { %vm216_vm5 = vcmp.eq.s32.totalorder %v1906_v31, %v212_v4 }
  0xba   : > { %v1533_v40 = vpop.eup %1532 }
  0xbb   : > { %v323_v41 = vsel %vm171_vm0, %v1533_v40, 0.0  ;;  %v1535_v43 = vpop.eup %1534  ;;  %v1896_v55 = vpop.permute.xlu0 %351 }
  0xbc   : > { %324 = vadd.xlane.f32.xlu0 %v323_v41  ;;  %v607_v44 = vsel %vm171_vm0, %v1535_v43, 0.0  ;;  %v358_v27 = vpop.permute.xlu1 %357  ;;  %vm360_vm7 = vcmp.eq.s32.totalorder %v1906_v31, %v1896_v55 }
  0xbd   : > { %vm362_vm8 = vcmp.eq.s32.totalorder %v1906_v31, %v358_v27 }
  0xbf   : > { %v355_v56 = vpop.permute.xlu0 %354 }
  0xc0   : > { %466 = vadd.xlane.f32.xlu0 %v465_v42  ;;  %v494_v37 = vpop.permute.xlu1 %493  ;;  %vm361_vm6 = vcmp.eq.s32.totalorder %v1906_v31, %v355_v56 }
  0xc1   : > { %vm502_vm10 = vcmp.eq.s32.totalorder %v1906_v31, %v494_v37 }
  0xc3   : > { %v1898_v57 = vpop.permute.xlu0 %490 }
  0xc4   : > { %608 = vadd.xlane.f32.xlu0 %v607_v44  ;;  %v497_v51 = vpop.permute.xlu1 %496  ;;  %vm501_vm9 = vcmp.eq.s32.totalorder %v1906_v31, %v1898_v57 }
  0xc5   : > { %vm503_vm12 = vcmp.eq.s32.totalorder %v1906_v31, %v497_v51  ;;  %v1443_v51 = vld [vmem:[%s1790_s29 + $0x80] sm:$0xff] }
  0xc7   : > { %v1900_v58 = vpop.permute.xlu0 %499 }
  0xc8   : > { %744 = vmax.xlane.f32.xlu0 %v743_v46  ;;  %vm504_vm11 = vcmp.eq.s32.totalorder %v1906_v31, %v1900_v58 }
  0xcb   : > { %v1902_v59 = vpop.permute.xlu0 %632 }
  0xcc   : > { %886 = vmax.xlane.f32.xlu0 %v885_v48  ;;  %vm643_vm13 = vcmp.eq.s32.totalorder %v1906_v31, %v1902_v59 }
  0xcf   : > { %v1904_v61 = vpop.permute.xlu0 %641 }
  0xd0   : > { %1170 = vmax.xlane.f32.xlu0 %v1169_v52 }
 0x145   : > { %v180_v63 = vpop.xlane.xlu0 %179 }
 0x146   : > { %1536 = vlog2.f32 %v180_v63 }
 0x149   : > { %v325_v0 = vpop.xlane.xlu0 %324 }
 0x14a   : > { %1538 = vlog2.f32 %v325_v0 }
 0x14d   : > { %v467_v5 = vpop.xlane.xlu0 %466 }
 0x14e   : > { %1540 = vlog2.f32 %v467_v5  ;;  %v636_v5 = vpop.permute.xlu1 %635 }
 0x14f   : > { %vm644_vm15 = vcmp.eq.s32.totalorder %v1906_v31, %v636_v5 }
 0x150   : > { %v1537_v8 = vpop.eup %1536 }
 0x151   : > { %v182_v28 = vmul.f32 0.6931472, %v1537_v8  ;;  %v609_v29 = vpop.xlane.xlu0 %608 }
 0x152   : > { %1542 = vlog2.f32 %v609_v29 }
 0x153   : > { %v183_v33 = vadd.f32 %v182_v28, %v1856_v25 }
 0x154   : > { %v1539_v34 = vpop.eup %1538 }
 0x155   : > { %v184_v35 = vsub.f32 %v183_v33, %v1768_v1  ;;  %v327_v36 = vmul.f32 0.6931472, %v1539_v34  ;;  %v1928_v62 = vpop.xlane.xlu0 %744 }
 0x156   : > { %v746_v8 = vsub.f32 %v1877_v45, %v1928_v62 }
 0x157   : > { %v328_v38 = vadd.f32 %v327_v36, %v1864_v30  ;;  %v219_v39 = vsel %vm215_vm2, %v184_v35, 0.0  ;;  %v217_v40 = vsel %vm213_vm1, %v184_v35, 0.0  ;;  %v218_v1 = vsel %vm214_vm3, %v184_v35, 0.0  ;;  %v639_v36 = vpop.permute.xlu1 %638 }
 0x158   : > { %v1541_v41 = vpop.eup %1540  ;;  %v227_v42 = vsel %vm171_vm0, %v219_v39, 0.0  ;;  %v221_v25 = vsel %vm171_vm0, %v217_v40, 0.0  ;;  %v224_v30 = vsel %vm171_vm0, %v218_v1, 0.0  ;;  %v747_v34 = vmul.f32 1.442695, %v746_v8 }
 0x159   : > { %v329_v43 = vsub.f32 %v328_v38, %v1771_v2  ;;  %v469_v44 = vmul.f32 0.6931472, %v1541_v41  ;;  %228 = vadd.xlane.f32.xlu0 %v227_v42  ;;  %222 = vadd.xlane.f32.xlu1 %v221_v25  ;;  %v220_v2 = vsel %vm216_vm5, %v184_v35, 0.0  ;;  %v1939_v29 = vpop.xlane.xlu0 %886  ;;  %vm645_vm14 = vcmp.eq.s32.totalorder %v1906_v31, %v639_v36 }
 0x15a   : > { %v230_v54 = vsel %vm171_vm0, %v220_v2, 0.0  ;;  %v888_v38 = vsub.f32 %v1882_v47, %v1939_v29  ;;  %1544 = vpow2.f32 %v747_v34  ;;  %vm646_vm1 = vcmp.eq.s32.totalorder %v1906_v31, %v1904_v61  ;;  %v1969_v61 = vld [vmem:[%s1790_s29 + $0x98] sm:$0xff] }
 0x15b   : > { %v363_v46 = vsel %vm359_vm4, %v329_v43, 0.0  ;;  %v470_v52 = vadd.f32 %v469_v44, %v1858_v26  ;;  %v365_v53 = vsel %vm361_vm6, %v329_v43, 0.0  ;;  %v364_v26 = vsel %vm360_vm7, %v329_v43, 0.0 }
 0x15c   : > { %v367_v48 = vsel %vm171_vm0, %v363_v46, 0.0  ;;  %v1543_v60 = vpop.eup %1542  ;;  %v373_v56 = vsel %vm171_vm0, %v365_v53, 0.0  ;;  %v366_v4 = vsel %vm362_vm8, %v329_v43, 0.0  ;;  %v370_v55 = vsel %vm171_vm0, %v364_v26, 0.0 }
 0x15d   : > { %225 = vadd.xlane.f32.xlu1 %v224_v30  ;;  %368 = vadd.xlane.f32.xlu0 %v367_v48  ;;  %v471_v63 = vsub.f32 %v470_v52, %v1774_v3  ;;  %v611_v0 = vmul.f32 0.6931472, %v1543_v60  ;;  %v376_v7 = vsel %vm171_vm0, %v366_v4, 0.0  ;;  %v1965_v52 = vld [vmem:[%s1790_s29 + $0x88] sm:$0xff]  ;;  %vm191_vm2 = vcmp.ne.s32.totalorder %v1793_v9, 4294967295 }
 0x15e   : > { %vm335_vm3 = vcmp.ne.s32.totalorder %v1797_v10, 4294967295  ;;  %vm336_vm4 = vcmp.ne.s32.totalorder %v1804_v12, 4294967295  ;;  %v1693_v2 = vmov 0.0   ;;  %vm239_vm5 = vcmask 7168  }
 0x15f   : > { %v612_v3 = vadd.f32 %v611_v0, %v1866_v32  ;;  %v506_v27 = vsel %vm502_vm10, %v471_v63, 0.0  ;;  %v505_v28 = vsel %vm501_vm9, %v471_v63, 0.0  ;;  %v507_v32 = vsel %vm503_vm12, %v471_v63, 0.0 }
 0x160   : > { %v512_v57 = vsel %vm171_vm0, %v506_v27, 0.0  ;;  %v509_v33 = vsel %vm171_vm0, %v505_v28, 0.0  ;;  %v508_v37 = vsel %vm504_vm11, %v471_v63, 0.0  ;;  %v515_v58 = vsel %vm171_vm0, %v507_v32, 0.0 }
 0x161   : > { %231 = vadd.xlane.f32.xlu1 %v230_v54  ;;  %374 = vadd.xlane.f32.xlu0 %v373_v56  ;;  %v613_v35 = vsub.f32 %v612_v3, %v1781_v6  ;;  %v518_v39 = vsel %vm171_vm0, %v508_v37, 0.0  ;;  %v889_v6 = vmul.f32 1.442695, %v888_v38  ;;  %v1413_v53 = vsel %vm191_vm2, 1.0, %v1693_v2 }
 0x162   : > { %vm337_vm6 = vcmp.ne.s32.totalorder %v1812_v14, 4294967295  ;;  %v1420_v60 = vsel %vm335_vm3, 1.0, %v1693_v2  ;;  %v1421_v54 = vsel %vm336_vm4, 1.0, %v1693_v2  ;;  %vm189_vm7 = vcmp.ne.s32.totalorder %v1801_v11, 4294967295 }
 0x163   : > { %v649_v40 = vsel %vm645_vm14, %v613_v35, 0.0  ;;  %v647_v41 = vsel %vm643_vm13, %v613_v35, 0.0  ;;  %1546 = vpow2.f32 %v889_v6  ;;  %v648_v59 = vsel %vm644_vm15, %v613_v35, 0.0 }
 0x164   : > { %v657_v42 = vsel %vm171_vm0, %v649_v40, 0.0  ;;  %v651_v47 = vsel %vm171_vm0, %v647_v41, 0.0  ;;  %v654_v25 = vsel %vm171_vm0, %v648_v59, 0.0  ;;  %v650_v43 = vsel %vm646_vm1, %v613_v35, 0.0  ;;  %v1545_v44 = vpop.eup %1544 }
 0x165   : > { %371 = vadd.xlane.f32.xlu1 %v370_v55  ;;  %377 = vadd.xlane.f32.xlu0 %v376_v7  ;;  %v660_v1 = vsel %vm171_vm0, %v650_v43, 0.0  ;;  %v749_v46 = vsel %vm171_vm0, %v1545_v44, 0.0  ;;  %v270_v56 = vsel %vm239_vm5, %v1413_v53, 0.0  ;;  %v1422_v9 = vsel %vm337_vm6, 1.0, %v1693_v2 }
 0x166   : > { %v385_v10 = vsel %vm239_vm5, %v1420_v60, 0.0  ;;  %vm477_vm8 = vcmp.ne.s32.totalorder %v1820_v16, 4294967295  ;;  %v400_v12 = vsel %vm239_vm5, %v1421_v54, 0.0  ;;  %v1411_v63 = vsel %vm189_vm7, 1.0, %v1693_v2 }
 0x167   : > { %vm190_vm9 = vcmp.ne.s32.totalorder %v1809_v13, 4294967295  ;;  %v271_v14 = vrot.slane %v270_v56, 4  ;;  %v415_v0 = vsel %vm239_vm5, %v1422_v9, 0.0  ;;  %v386_v26 = vrot.slane %v385_v10, 4 }
 0x168   : > { %v1429_v11 = vsel %vm477_vm8, 1.0, %v1693_v2  ;;  %vm480_vm10 = vcmp.ne.s32.totalorder %v1828_v18, 4294967295  ;;  %v401_v4 = vrot.slane %v400_v12, 4  ;;  %v240_v5 = vsel %vm239_vm5, %v1411_v63, 0.0 }
 0x169   : > { %513 = vadd.xlane.f32.xlu0 %v512_v57  ;;  %510 = vadd.xlane.f32.xlu1 %v509_v33  ;;  %v1412_v55 = vsel %vm190_vm9, 1.0, %v1693_v2  ;;  %v416_v16 = vrot.slane %v415_v0, 4  ;;  %vm619_vm11 = vcmp.ne.s32.totalorder %v1836_v20, 4294967295  ;;  %v272_v7 = vadd.f32 %v271_v14, %v270_v56 }
 0x16a   : > { %v527_v8 = vsel %vm239_vm5, %v1429_v11, 0.0  ;;  %v1432_v13 = vsel %vm480_vm10, 1.0, %v1693_v2  ;;  %vm192_vm12 = vcmp.ne.s32.totalorder %v1817_v15, 4294967295  ;;  %v387_v3 = vadd.f32 %v386_v26, %v385_v10 }
 0x16b   : > { %v241_v27 = vrot.slane %v240_v5, 4  ;;  %v255_v28 = vsel %vm239_vm5, %v1412_v55, 0.0  ;;  %vm338_vm13 = vcmp.ne.s32.totalorder %v1825_v17, 4294967295  ;;  %v402_v18 = vadd.f32 %v401_v4, %v400_v12 }
 0x16c   : > { %v1438_v57 = vsel %vm619_vm11, 1.0, %v1693_v2  ;;  %v417_v33 = vadd.f32 %v416_v16, %v415_v0  ;;  %v528_v34 = vrot.slane %v527_v8, 4  ;;  %v572_v20 = vsel %vm239_vm5, %v1432_v13, 0.0 }
 0x16d   : > { %516 = vadd.xlane.f32.xlu0 %v515_v58  ;;  %519 = vadd.xlane.f32.xlu1 %v518_v39  ;;  %v1547_v30 = vpop.eup %1546  ;;  %v1414_v35 = vsel %vm192_vm12, 1.0, %v1693_v2  ;;  %v273_v36 = vrot.slane %v272_v7, 2  ;;  %v256_v32 = vrot.slane %v255_v28, 4  ;;  %v1423_v37 = vsel %vm338_vm13, 1.0, %v1693_v2 }
 0x16e   : > { %v891_v48 = vsel %vm171_vm0, %v1547_v30, 0.0  ;;  %v388_v15 = vrot.slane %v387_v3, 2  ;;  %v669_v38 = vsel %vm239_vm5, %v1438_v57, 0.0  ;;  %v242_v58 = vadd.f32 %v241_v27, %v240_v5 }
 0x16f   : > { %v403_v39 = vrot.slane %v402_v18, 2  ;;  %v573_v6 = vrot.slane %v572_v20, 4  ;;  %v285_v17 = vsel %vm239_vm5, %v1414_v35, 0.0  ;;  %vm478_vm14 = vcmp.ne.s32.totalorder %v1832_v19, 4294967295  ;;  %v2016_v35 = vpop.xlane.xlu1 %1028 }
 0x170   : > { %v418_v40 = vrot.slane %v417_v33, 2  ;;  %v529_v41 = vadd.f32 %v528_v34, %v527_v8  ;;  %vm479_vm15 = vcmp.ne.s32.totalorder %v1840_v21, 4294967295  ;;  %v670_v59 = vrot.slane %v669_v38, 4 }
 0x171   : > { %658 = vadd.xlane.f32.xlu0 %v657_v42  ;;  %652 = vadd.xlane.f32.xlu1 %v651_v47  ;;  %v430_v42 = vsel %vm239_vm5, %v1423_v37, 0.0  ;;  %v274_v47 = vadd.f32 %v273_v36, %v272_v7  ;;  %vm622_vm1 = vcmp.ne.s32.totalorder %v1844_v22, 4294967295  ;;  %v389_v43 = vadd.f32 %v388_v15, %v387_v3  ;;  %v2018_v36 = vpop.xlane.xlu0 %1170 }
 0x172   : > { %v243_v44 = vrot.slane %v242_v58, 2  ;;  %v404_v30 = vadd.f32 %v403_v39, %v402_v18  ;;  %v1431_v19 = vsel %vm479_vm15, 1.0, %v1693_v2  ;;  %v419_v53 = vadd.f32 %v418_v40, %v417_v33 }
 0x173   : > { %v530_v60 = vrot.slane %v529_v41, 2  ;;  %v1441_v54 = vsel %vm622_vm1, 1.0, %v1693_v2  ;;  %v275_v21 = vrot.slane %v274_v47, 1  ;;  %v671_v56 = vadd.f32 %v670_v59, %v669_v38 }
 0x174   : > { %v390_v10 = vrot.slane %v389_v43, 1  ;;  %v244_v12 = vadd.f32 %v243_v44, %v242_v58  ;;  %v557_v14 = vsel %vm239_vm5, %v1431_v19, 0.0  ;;  %v405_v0 = vrot.slane %v404_v30, 1 }
 0x175   : > { %655 = vadd.xlane.f32.xlu1 %v654_v25  ;;  %v257_v25 = vadd.f32 %v256_v32, %v255_v28  ;;  %v531_v4 = vadd.f32 %v530_v60, %v529_v41  ;;  %v714_v5 = vsel %vm239_vm5, %v1441_v54, 0.0  ;;  %vm621_vm2 = vcmp.ne.s32.totalorder %v1853_v24, 4294967295 }
 0x176   : > { %v420_v16 = vrot.slane %v419_v53, 1  ;;  %v672_v7 = vrot.slane %v671_v56, 2  ;;  %v558_v13 = vrot.slane %v557_v14, 4  ;;  %v276_v3 = vadd.f32 %v275_v21, %v274_v47 }
 0x177   : > { %v258_v9 = vrot.slane %v257_v25, 2  ;;  %v391_v27 = vadd.f32 %v390_v10, %v389_v43  ;;  %v245_v28 = vrot.slane %v244_v12, 1  ;;  %v715_v33 = vrot.slane %v714_v5, 4 }
 0x178   : > { %v406_v32 = vadd.f32 %v405_v0, %v404_v30  ;;  %v532_v37 = vrot.slane %v531_v4, 1  ;;  %v421_v15 = vadd.f32 %v420_v16, %v419_v53  ;;  %v673_v38 = vadd.f32 %v672_v7, %v671_v56 }
 0x179   : > { %661 = vadd.xlane.f32.xlu1 %v660_v1  ;;  %v286_v1 = vrot.slane %v285_v17, 4  ;;  %v259_v8 = vadd.f32 %v258_v9, %v257_v25  ;;  %v559_v39 = vadd.f32 %v558_v13, %v557_v14  ;;  %1548 = vrcp.f32 %v276_v3 }
 0x17a   : > { %1550 = vrcp.f32 %v391_v27  ;;  %v533_v59 = vadd.f32 %v532_v37, %v531_v4  ;;  %v674_v43 = vrot.slane %v673_v38, 1  ;;  %vm620_vm4 = vcmp.ne.s32.totalorder %v1848_v23, 4294967295 }
 0x17b   : > { %v287_v63 = vadd.f32 %v286_v1, %v285_v17  ;;  %v260_v58 = vrot.slane %v259_v8, 1  ;;  %1552 = vrcp.f32 %v406_v32  ;;  %v560_v1 = vrot.slane %v559_v39, 2 }
 0x17c   : > { %v675_v10 = vadd.f32 %v674_v43, %v673_v38  ;;  %vm307_vm8 = vcmask 15360   ;;  %vm309_vm9 = vcmask 23552   ;;  %vm762_vm10 = vcmp.ne.s32.totalorder %v1965_v52, 4294967295 }
 0x17d   : > { %750 = vadd.xlane.f32.xlu1 %v749_v46  ;;  %v1430_v46 = vsel %vm478_vm14, 1.0, %v1693_v2  ;;  %v288_v18 = vrot.slane %v287_v63, 2  ;;  %v261_v44 = vadd.f32 %v260_v58, %v259_v8  ;;  %vm311_vm13 = vcmask 24576  }
 0x17e   : > { %v542_v22 = vsel %vm239_vm5, %v1430_v46, 0.0 }
 0x17f   : > { %v543_v55 = vrot.slane %v542_v22, 4  ;;  %v289_v17 = vadd.f32 %v288_v18, %v287_v63 }
 0x181   : > { %892 = vadd.xlane.f32.xlu1 %v891_v48  ;;  %v574_v48 = vadd.f32 %v573_v6, %v572_v20  ;;  %v1440_v20 = vsel %vm621_vm2, 1.0, %v1693_v2  ;;  %v544_v24 = vadd.f32 %v543_v55, %v542_v22  ;;  %v246_v6 = vadd.f32 %v245_v28, %v244_v12 }
 0x182   : > { %v699_v40 = vsel %vm239_vm5, %v1440_v20, 0.0  ;;  %v561_v12 = vadd.f32 %v560_v1, %v559_v39 }
 0x183   : > { %v575_v26 = vrot.slane %v574_v48, 2  ;;  %v545_v25 = vrot.slane %v544_v24, 2  ;;  %v700_v46 = vrot.slane %v699_v40, 4  ;;  %1554 = vrcp.f32 %v246_v6  ;;  %v2021_v7 = vpop.eup %1548 }
 0x184   : > { %1556 = vrcp.f32 %v421_v15  ;;  %v1551_v28 = vpop.eup %1550 }
 0x185   : > { %v576_v57 = vadd.f32 %v575_v26, %v574_v48  ;;  %1558 = vrcp.f32 %v533_v59  ;;  %v546_v56 = vadd.f32 %v545_v25, %v544_v24  ;;  %v701_v63 = vadd.f32 %v700_v46, %v699_v40  ;;  %v2025_v32 = vpop.eup %1552 }
 0x186   : > { %1560 = vrcp.f32 %v261_v44 }
 0x187   : > { %774 = vperm.xlu0 %1526, %v1443_v51   ;;  %v431_v51 = vrot.slane %v430_v42, 4  ;;  %v577_v41 = vrot.slane %v576_v57, 1  ;;  %v547_v8 = vrot.slane %v546_v56, 1 }
 0x189   : > { %v432_v11 = vadd.f32 %v431_v51, %v430_v42  ;;  %v716_v42 = vadd.f32 %v715_v33, %v714_v5  ;;  %v290_v51 = vrot.slane %v289_v17, 1  ;;  %v578_v60 = vadd.f32 %v577_v41, %v576_v57 }
 0x18a   : > { %v562_v57 = vrot.slane %v561_v12, 1  ;;  %v702_v33 = vrot.slane %v701_v63, 2 }
 0x18b   : > { %v433_v34 = vrot.slane %v432_v11, 2  ;;  %v717_v54 = vrot.slane %v716_v42, 2  ;;  %v291_v26 = vadd.f32 %v290_v51, %v289_v17  ;;  %1562 = vrcp.f32 %v578_v60 }
 0x18c   : > { %1564 = vrcp.f32 %v675_v10  ;;  %v548_v17 = vadd.f32 %v547_v8, %v546_v56  ;;  %v563_v59 = vadd.f32 %v562_v57, %v561_v12  ;;  %v703_v25 = vadd.f32 %v702_v33, %v701_v63 }
 0x18d   : > { %v434_v47 = vadd.f32 %v433_v34, %v432_v11  ;;  %v2023_v18 = vadd.f32 %v717_v54, %v716_v42  ;;  %1566 = vrcp.f32 %v291_v26  ;;  %v1555_v6 = vpop.eup %1554 }
 0x18f   : > { %v435_v21 = vrot.slane %v434_v47, 1 }
 0x191   : > { %v436_v55 = vadd.f32 %v435_v21, %v434_v47  ;;  %v2027_v47 = vpop.eup %1556 }
 0x192   : > { %777 = vperm.xlu1 %1527, %v1965_v52  }
 0x193   : > { %1568 = vrcp.f32 %v436_v55 }
 0x194   : > { %1570 = vrcp.f32 %v548_v17 }
 0x195   : > { %1572 = vrcp.f32 %v563_v59 }
 0x196   : > { %783 = vperm.xlu1 %1527, %v1969_v61  }
 0x1e6   : > { %v223_v30 = vpop.xlane.xlu1 %222  ;;  %v229_v48 = vpop.xlane.xlu0 %228 }
 0x1e7   : > { %v233_v19 = vrot.slane %v223_v30, 4  ;;  %v264_v53 = vrot.slane %v229_v48, 4 }
 0x1e9   : > { %v234_v9 = vadd.f32 %v233_v19, %v223_v30  ;;  %v265_v22 = vadd.f32 %v264_v53, %v229_v48  ;;  %v2029_v30 = vpop.eup %1558 }
 0x1ea   : > { %v226_v14 = vpop.xlane.xlu1 %225  ;;  %v369_v0 = vpop.xlane.xlu0 %368 }
 0x1eb   : > { %v235_v11 = vrot.slane %v234_v9, 2  ;;  %v249_v4 = vrot.slane %v226_v14, 4  ;;  %v379_v5 = vrot.slane %v369_v0, 4  ;;  %v266_v16 = vrot.slane %v265_v22, 2  ;;  %v1561_v60 = vpop.eup %1560 }
 0x1ed   : > { %v236_v13 = vadd.f32 %v235_v11, %v234_v9  ;;  %v250_v3 = vadd.f32 %v249_v4, %v226_v14  ;;  %v380_v27 = vadd.f32 %v379_v5, %v369_v0  ;;  %v267_v38 = vadd.f32 %v266_v16, %v265_v22  ;;  %v2033_v14 = vpop.eup %1562 }
 0x1ee   : > { %v232_v34 = vpop.xlane.xlu1 %231  ;;  %v375_v20 = vpop.xlane.xlu0 %374  ;;  %v704_v0 = vrot.slane %v703_v25, 1 }
 0x1ef   : > { %v237_v37 = vrot.slane %v236_v13, 1  ;;  %v251_v24 = vrot.slane %v250_v3, 2  ;;  %v381_v15 = vrot.slane %v380_v27, 2  ;;  %v279_v58 = vrot.slane %v232_v34, 4 }
 0x1f0   : > { %v409_v39 = vrot.slane %v375_v20, 4  ;;  %v268_v54 = vrot.slane %v267_v38, 1 }
 0x1f1   : > { %v238_v40 = vadd.f32 %v237_v37, %v236_v13  ;;  %v252_v41 = vadd.f32 %v251_v24, %v250_v3  ;;  %v382_v42 = vadd.f32 %v381_v15, %v380_v27  ;;  %v280_v43 = vadd.f32 %v279_v58, %v232_v34  ;;  %v2035_v3 = vpop.eup %1564 }
 0x1f2   : > { %v410_v44 = vadd.f32 %v409_v39, %v375_v20  ;;  %v372_v1 = vpop.xlane.xlu1 %371  ;;  %v378_v46 = vpop.xlane.xlu0 %377  ;;  %v269_v27 = vadd.f32 %v268_v54, %v267_v38 }
 0x1f3   : > { %v253_v48 = vrot.slane %v252_v41, 1  ;;  %v383_v51 = vrot.slane %v382_v42, 1  ;;  %v394_v19 = vrot.slane %v372_v1, 4  ;;  %v424_v53 = vrot.slane %v378_v46, 4  ;;  %v1567_v20 = vpop.eup %1566 }
 0x1f4   : > { %v281_v21 = vrot.slane %v280_v43, 2  ;;  %v411_v56 = vrot.slane %v410_v44, 2  ;;  %v2031_v9 = vmul.f32 %v1555_v6, %v238_v40  ;;  %v1569_v39 = vpop.eup %1568  ;;  %v719_v6 = vrot.slane %v2023_v18, 1 }
 0x1f5   : > { %v254_v22 = vadd.f32 %v253_v48, %v252_v41  ;;  %v384_v10 = vadd.f32 %v383_v51, %v382_v42  ;;  %v395_v12 = vadd.f32 %v394_v19, %v372_v1  ;;  %v425_v63 = vadd.f32 %v424_v53, %v378_v46 }
 0x1f6   : > { %v282_v26 = vadd.f32 %v281_v21, %v280_v43  ;;  %v412_v11 = vadd.f32 %v411_v56, %v410_v44  ;;  %v511_v4 = vpop.xlane.xlu1 %510  ;;  %v514_v5 = vpop.xlane.xlu0 %513  ;;  %v705_v1 = vadd.f32 %v704_v0, %v703_v25  ;;  %v278_v51 = vmul.f32 %v2021_v7, %v269_v27 }
 0x1f7   : > { %v396_v55 = vrot.slane %v395_v12, 2  ;;  %v426_v16 = vrot.slane %v425_v63, 2  ;;  %v521_v8 = vrot.slane %v511_v4, 4  ;;  %v536_v13 = vrot.slane %v514_v5, 4 }
 0x1f8   : > { %v283_v57 = vrot.slane %v282_v26, 1  ;;  %v263_v33 = vmul.f32 %v1561_v60, %v254_v22  ;;  %v2037_v34 = vmul.f32 %v1551_v28, %v384_v10  ;;  %v413_v40 = vrot.slane %v412_v11, 1 }
 0x1f9   : > { %v397_v37 = vadd.f32 %v396_v55, %v395_v12  ;;  %v427_v24 = vadd.f32 %v426_v16, %v425_v63  ;;  %v522_v15 = vadd.f32 %v521_v8, %v511_v4  ;;  %v537_v58 = vadd.f32 %v536_v13, %v514_v5  ;;  %v1571_v4 = vpop.eup %1570 }
 0x1fa   : > { %v284_v17 = vadd.f32 %v283_v57, %v282_v26  ;;  %295 = vrot.lane.b32.xlu1 %v263_v33, %s1694_s30  ;;  %v520_v41 = vpop.xlane.xlu1 %519  ;;  %v517_v38 = vpop.xlane.xlu0 %516  ;;  %v414_v54 = vadd.f32 %v413_v40, %v412_v11  ;;  %v720_v57 = vadd.f32 %v719_v6, %v2023_v18  ;;  %1574 = vrcp.f32 %v705_v1 }
 0x1fb   : > { %v398_v42 = vrot.slane %v397_v37, 1  ;;  %v428_v43 = vrot.slane %v427_v24, 1  ;;  %v523_v28 = vrot.slane %v522_v15, 2  ;;  %v538_v44 = vrot.slane %v537_v58, 2 }
 0x1fc   : > { %v566_v46 = vrot.slane %v520_v41, 4  ;;  %v551_v48 = vrot.slane %v517_v38, 4  ;;  %v293_v12 = vmul.f32 %v1567_v20, %v284_v17  ;;  %v423_v40 = vmul.f32 %v2027_v47, %v414_v54 }
 0x1fd   : > { %v399_v19 = vadd.f32 %v398_v42, %v397_v37  ;;  %v429_v53 = vadd.f32 %v428_v43, %v427_v24  ;;  %v524_v60 = vadd.f32 %v523_v28, %v522_v15  ;;  %v539_v59 = vadd.f32 %v538_v44, %v537_v58  ;;  %v1573_v58 = vpop.eup %1572 }
 0x1fe   : > { %v567_v21 = vadd.f32 %v566_v46, %v520_v41  ;;  %v552_v56 = vadd.f32 %v551_v48, %v517_v38  ;;  %299 = vrot.lane.b32.xlu1 %v278_v51, %s1695_s3  ;;  %v653_v22 = vpop.xlane.xlu1 %652  ;;  %v659_v10 = vpop.xlane.xlu0 %658  ;;  %1576 = vrcp.f32 %v720_v57 }
 0x1ff   : > { %v525_v63 = vrot.slane %v524_v60, 1  ;;  %v540_v26 = vrot.slane %v539_v59, 1  ;;  %v663_v25 = vrot.slane %v653_v22, 4  ;;  %v693_v0 = vrot.slane %v659_v10, 4 }
 0x200   : > { %v568_v5 = vrot.slane %v567_v21, 2  ;;  %v553_v7 = vrot.slane %v552_v56, 2  ;;  %v2044_v55 = vmul.f32 %v2025_v32, %v399_v19  ;;  %v2046_v16 = vmul.f32 %v1569_v39, %v429_v53 }
 0x201   : > { %v526_v11 = vadd.f32 %v525_v63, %v524_v60  ;;  %v541_v8 = vadd.f32 %v540_v26, %v539_v59  ;;  %v664_v13 = vadd.f32 %v663_v25, %v653_v22  ;;  %v694_v27 = vadd.f32 %v693_v0, %v659_v10 }
 0x202   : > { %v569_v33 = vadd.f32 %v568_v5, %v567_v21  ;;  %v554_v20 = vadd.f32 %v553_v7, %v552_v56  ;;  %303 = vrot.lane.b32.xlu1 %v293_v12, %s1696_s4  ;;  %v2050_v37 = vpop.xlane.xlu1 %655  ;;  %v1172_v12 = vsub.f32 %v1890_v50, %v2018_v36 }
 0x203   : > { %v665_v24 = vrot.slane %v664_v13, 2  ;;  %v695_v15 = vrot.slane %v694_v27, 2  ;;  %v2052_v32 = vmul.f32 %v1571_v4, %v541_v8  ;;  %v2056_v41 = vmul.f32 %v2029_v30, %v526_v11 }
 0x204   : > { %v570_v39 = vrot.slane %v569_v33, 1  ;;  %v555_v17 = vrot.slane %v554_v20, 1  ;;  %v1030_v30 = vsub.f32 %v1887_v49, %v2016_v35  ;;  %v1575_v54 = vpop.eup %1574  ;;  %v1439_v8 = vsel %vm620_vm4, 1.0, %v1693_v2 }
 0x205   : > { %v666_v18 = vadd.f32 %v665_v24, %v664_v13  ;;  %v696_v6 = vadd.f32 %v695_v15, %v694_v27  ;;  %vm764_vm4 = vcmp.ne.s32.totalorder %v1969_v61, 4294967295 }
 0x206   : > { %v556_v38 = vadd.f32 %v555_v17, %v554_v20  ;;  %444 = vrot.lane.b32.xlu1 %v423_v40, %s1695_s3  ;;  %v662_v42 = vpop.xlane.xlu1 %661  ;;  %v571_v44 = vadd.f32 %v570_v39, %v569_v33  ;;  %v1031_v10 = vmul.f32 1.442695, %v1030_v30  ;;  %v775_v0 = vpop.permute.xlu0 %774 }
 0x207   : > { %v667_v43 = vrot.slane %v666_v18, 1  ;;  %v708_v28 = vrot.slane %v662_v42, 4  ;;  %v697_v1 = vrot.slane %v696_v6, 1  ;;  %vm785_vm3 = vcmp.eq.s32.totalorder %v1906_v31, %v775_v0 }
 0x208   : > { %v565_v46 = vmul.f32 %v1573_v58, %v556_v38  ;;  %v580_v60 = vmul.f32 %v2033_v14, %v571_v44  ;;  %v1577_v22 = vpop.eup %1576  ;;  %v1173_v14 = vmul.f32 1.442695, %v1172_v12  ;;  %v678_v58 = vrot.slane %v2050_v37, 4 }
 0x209   : > { %v668_v48 = vadd.f32 %v667_v43, %v666_v18  ;;  %v709_v51 = vadd.f32 %v708_v28, %v662_v42  ;;  %v698_v53 = vadd.f32 %v697_v1, %v696_v6  ;;  %v2092_v42 = vld [vmem:[%s1790_s29 + $0x90] sm:$0xff] }
 0x20a   : > { %586 = vrot.lane.b32.xlu1 %v565_v46, %s1695_s3  ;;  %v751_v47 = vpop.xlane.xlu1 %750  ;;  %v679_v17 = vadd.f32 %v678_v58, %v2050_v37 }
 0x20b   : > { %v710_v19 = vrot.slane %v709_v51, 2  ;;  %1578 = vlog2.f32 %v751_v47  ;;  %v2064_v59 = vmul.f32 %v2035_v3, %v668_v48  ;;  %v707_v63 = vmul.f32 %v1575_v54, %v698_v53  ;;  %v2105_v47 = vld [vmem:[%s1790_s29 + $0xb0] sm:$0xff] }
 0x20c   : > { %1580 = vpow2.f32 %v1031_v10  ;;  %v680_v43 = vrot.slane %v679_v17, 2 }
 0x20d   : > { %v711_v21 = vadd.f32 %v710_v19, %v709_v51  ;;  %1582 = vpow2.f32 %v1173_v14  ;;  %v2109_v19 = vld [vmem:[%s1790_s29 + $0xc8] sm:$0xff] }
 0x20e   : > { %590 = vrot.lane.b32.xlu1 %v580_v60, %s1696_s4  ;;  %v2083_v33 = vpop.xlane.xlu1 %892  ;;  %v681_v44 = vadd.f32 %v680_v43, %v679_v17  ;;  %v2151_v17 = vld [vmem:[%s1790_s29 + $0xa8] sm:$0xff]  ;;  %v2163_v43 = vld [vmem:[%s1790_s29 + $0xf0] sm:$0xff] }
 0x20f   : > { %v712_v56 = vrot.slane %v711_v21, 1 }
 0x210   : > { %v682_v1 = vrot.slane %v681_v44, 1 }
 0x211   : > { %v713_v26 = vadd.f32 %v712_v56, %v711_v21 }
 0x212   : > { %728 = vrot.lane.b32.xlu1 %v707_v63, %s1695_s3  ;;  %v778_v24 = vpop.permute.xlu1 %777  ;;  %v683_v46 = vadd.f32 %v682_v1, %v681_v44  ;;  %v2168_v1 = vld [vmem:[%s1790_s29 + $0xa0] sm:$0xff] }
 0x213   : > { %v722_v49 = vmul.f32 %v1577_v22, %v713_v26  ;;  %vm786_vm6 = vcmp.eq.s32.totalorder %v1906_v31, %v778_v24 }
 0x215   : > { %v1579_v25 = vpop.eup %1578 }
 0x216   : > { %v753_v3 = vmul.f32 0.6931472, %v1579_v25  ;;  %732 = vrot.lane.b32.xlu1 %v722_v49, %s1696_s4  ;;  %v1581_v11 = vpop.eup %1580  ;;  %v784_v40 = vpop.permute.xlu1 %783 }
 0x217   : > { %v1033_v13 = vsel %vm171_vm0, %v1581_v11, 0.0  ;;  %v1583_v27 = vpop.eup %1582  ;;  %vm788_vm7 = vcmp.eq.s32.totalorder %v1906_v31, %v784_v40 }
 0x218   : > { %v754_v4 = vadd.f32 %v753_v3, %v1928_v62  ;;  %v684_v62 = vsel %vm239_vm5, %v1439_v8, 0.0  ;;  %v1175_v57 = vsel %vm171_vm0, %v1583_v27, 0.0 }
 0x21a   : > { %v2073_v5 = vsub.f32 %v754_v4, %v1877_v45  ;;  %v685_v45 = vrot.slane %v684_v62, 4 }
 0x21c   : > { %v789_v50 = vsel %vm785_vm3, %v2073_v5, 0.0  ;;  %v686_v23 = vadd.f32 %v685_v45, %v684_v62  ;;  %v790_v18 = vsel %vm786_vm6, %v2073_v5, 0.0  ;;  %v792_v28 = vsel %vm788_vm7, %v2073_v5, 0.0 }
 0x21d   : > { %v793_v7 = vsel %vm171_vm0, %v789_v50, 0.0  ;;  %v796_v38 = vsel %vm171_vm0, %v790_v18, 0.0  ;;  %v802_v37 = vsel %vm171_vm0, %v792_v28, 0.0  ;;  %v2155_v18 = vld [vmem:[%s1790_s29 + $0xb8] sm:$0xff]  ;;  %vm763_vm3 = vcmp.ne.s32.totalorder %v2092_v42, 4294967295 }
 0x21e   : > { %794 = vadd.xlane.f32.xlu0 %v793_v7  ;;  %v687_v20 = vrot.slane %v686_v23, 2 }
 0x220   : > { %v688_v15 = vadd.f32 %v687_v20, %v686_v23 }
 0x222   : > { %1034 = vadd.xlane.f32.xlu0 %v1033_v13  ;;  %v689_v39 = vrot.slane %v688_v15, 1 }
 0x224   : > { %v690_v6 = vadd.f32 %v689_v39, %v688_v15 }
 0x226   : > { %1176 = vadd.xlane.f32.xlu0 %v1175_v57  ;;  %1584 = vrcp.f32 %v690_v6 }
 0x230   : > { %v1585_v48 = vpop.eup %1584 }
 0x231   : > { %v692_v51 = vmul.f32 %v1585_v48, %v683_v46  ;;  %v2172_v46 = vld [vmem:[%s1790_s29 + $0xe0] sm:$0xff] }
 0x23a   : > { %797 = vadd.xlane.f32.xlu1 %v796_v38 }
 0x23c   : > { %780 = vperm.xlu0 %1526, %v2092_v42  }
 0x23e   : > { %803 = vadd.xlane.f32.xlu1 %v802_v37 }
 0x240   : > { %440 = vrot.lane.b32.xlu0 %v2044_v55, %s1694_s30  ;;  %v2113_v55 = vld [vmem:[%s1790_s29 + $0xd0] sm:$0xff] }
 0x244   : > { %448 = vrot.lane.b32.xlu0 %v2046_v16, %s1696_s4  ;;  %v2117_v16 = vld [vmem:[%s1790_s29 + $0xd8] sm:$0xff] }
 0x248   : > { %582 = vrot.lane.b32.xlu0 %v2052_v32, %s1694_s30  ;;  %v2121_v32 = vld [vmem:[%s1790_s29 + $0xf8] sm:$0xff] }
 0x24c   : > { %724 = vrot.lane.b32.xlu0 %v692_v51, %s1694_s30 }
 0x24f   : > { %922 = vperm.xlu1 %1527, %v2105_v47  }
 0x253   : > { %1061 = vperm.xlu1 %1527, %v2109_v19  }
 0x257   : > { %1064 = vperm.xlu1 %1527, %v2113_v55  }
 0x25b   : > { %1067 = vperm.xlu1 %1527, %v2117_v16  }
 0x25f   : > { %1209 = vperm.xlu1 %1527, %v2121_v32  }
 0x26c   : > { %v296_v30 = vpop.permute.xlu1 %295 }
 0x26d   : > { %v306_v53 = vsel %vm239_vm5, %v2031_v9, %v296_v30  ;;  %v1448_v9 = vsel %vm762_vm10, 1.0, %v1693_v2 }
 0x26e   : > { %v826_v14 = vsel %vm239_vm5, %v1448_v9, 0.0 }
 0x26f   : > { %v827_v0 = vrot.slane %v826_v14, 4 }
 0x270   : > { %v300_v60 = vpop.permute.xlu1 %299 }
 0x271   : > { %v308_v54 = vsel %vm307_vm8, %v306_v53, %v300_v60  ;;  %v828_v52 = vadd.f32 %v827_v0, %v826_v14 }
 0x273   : > { %v829_v13 = vrot.slane %v828_v52, 2 }
 0x274   : > { %v304_v21 = vpop.permute.xlu1 %303 }
 0x275   : > { %v2128_v56 = vsel %vm309_vm9, %v308_v54, %v304_v21  ;;  %v830_v45 = vadd.f32 %v829_v13, %v828_v52  ;;  %v1624_v54 = vld [vmem:[%s1765_s25 + $0x28] sm:$0xff] }
 0x277   : > { %v831_v24 = vrot.slane %v830_v45, 1 }
 0x278   : > { %v2132_v10 = vpop.permute.xlu1 %444 }
 0x279   : > { %v832_v39 = vadd.f32 %v831_v24, %v830_v45 }
 0x27b   : > { %1586 = vrcp.f32 %v832_v39 }
 0x27c   : > { %v2134_v63 = vpop.permute.xlu1 %586  ;;  %1588 = vlog2.f32 %v2083_v33 }
 0x280   : > { %v2140_v49 = vpop.permute.xlu1 %590 }
 0x284   : > { %v729_v4 = vpop.permute.xlu1 %728 }
 0x285   : > { %v1587_v37 = vpop.eup %1586 }
 0x286   : > { %v1589_v48 = vpop.eup %1588 }
 0x287   : > { %v895_v30 = vmul.f32 0.6931472, %v1589_v48 }
 0x288   : > { %v733_v8 = vpop.permute.xlu1 %732 }
 0x289   : > { %v896_v53 = vadd.f32 %v895_v30, %v1939_v29 }
 0x28b   : > { %v2181_v21 = vsub.f32 %v896_v53, %v1624_v54 }
 0x2ab   : > { %v2130_v22 = vpop.xlane.xlu0 %794 }
 0x2af   : > { %v1035_v12 = vpop.xlane.xlu0 %1034 }
 0x2b0   : > { %1590 = vlog2.f32 %v1035_v12 }
 0x2b3   : > { %v2137_v26 = vpop.xlane.xlu0 %1176 }
 0x2b4   : > { %1592 = vlog2.f32 %v2137_v26  ;;  %v1625_v26 = vld [vmem:[%s1765_s25 + $0x30] sm:$0xff] }
 0x2bb   : > { %v781_v25 = vpop.permute.xlu0 %780 }
 0x2bc   : > { %vm787_vm11 = vcmp.eq.s32.totalorder %v1906_v31, %v781_v25  ;;  %v1591_v25 = vpop.eup %1590 }
 0x2bd   : > { %v791_v3 = vsel %vm787_vm11, %v2073_v5, 0.0 }
 0x2be   : > { %v799_v50 = vsel %vm171_vm0, %v791_v3, 0.0 }
 0x2bf   : > { %800 = vadd.xlane.f32.xlu0 %v799_v50  ;;  %v441_v7 = vpop.permute.xlu0 %440 }
 0x2c0   : > { %v451_v9 = vsel %vm239_vm5, %v2037_v34, %v441_v7 }
 0x2c1   : > { %v452_v29 = vsel %vm307_vm8, %v451_v9, %v2132_v10 }
 0x2c3   : > { %v449_v11 = vpop.permute.xlu0 %448 }
 0x2c4   : > { %v453_v0 = vsel %vm309_vm9, %v452_v29, %v449_v11  ;;  %v1450_v29 = vsel %vm764_vm4, 1.0, %v1693_v2 }
 0x2c7   : > { %v583_v27 = vpop.permute.xlu0 %582  ;;  %v798_v62 = vpop.xlane.xlu1 %797 }
 0x2c8   : > { %v820_v57 = vrot.slane %v798_v62, 4  ;;  %v593_v33 = vsel %vm239_vm5, %v2056_v41, %v583_v27  ;;  %v454_v41 = vsel %vm311_vm13, %v453_v0, inf  ;;  %v856_v0 = vsel %vm239_vm5, %v1450_v29, 0.0 }
 0x2c9   : > { %v594_v34 = vsel %vm307_vm8, %v593_v33, %v2134_v63  ;;  %v1593_v63 = vpop.eup %1592 }
 0x2ca   : > { %v821_v58 = vadd.f32 %v820_v57, %v798_v62  ;;  %v595_v50 = vsel %vm309_vm9, %v594_v34, %v2140_v49  ;;  %v857_v34 = vrot.slane %v856_v0, 4 }
 0x2cb   : > { %v725_v23 = vpop.permute.xlu0 %724  ;;  %v2176_v51 = vpop.xlane.xlu1 %803  ;;  %v596_v52 = vsel %vm311_vm13, %v595_v50, inf  ;;  %v312_v50 = vsel %vm311_vm13, %v2128_v56, inf }
 0x2cc   : > { %v735_v5 = vsel %vm239_vm5, %v2064_v59, %v725_v23  ;;  %v822_v40 = vrot.slane %v821_v58, 2  ;;  %v2159_v59 = vld [vmem:[%s1790_s29 + $0xe8] sm:$0xff] }
 0x2cd   : > { %v736_v20 = vsel %vm307_vm8, %v735_v5, %v729_v4  ;;  %v1037_v4 = vmul.f32 0.6931472, %v1591_v25  ;;  %vm1188_vm4 = vcmp.ne.s32.totalorder %v2159_v59, 4294967295 }
 0x2ce   : > { %v737_v15 = vsel %vm309_vm9, %v736_v20, %v733_v8  ;;  %v823_v6 = vadd.f32 %v822_v40, %v821_v58  ;;  %v1626_v20 = vld [vmem:[%s1765_s25 + $0x38] sm:$0xff] }
 0x2cf   : > { %v923_v60 = vpop.permute.xlu1 %922  ;;  %v1038_v10 = vadd.f32 %v1037_v4, %v2016_v35  ;;  %v738_v8 = vsel %vm311_vm13, %v737_v15, inf  ;;  %v1179_v35 = vmul.f32 0.6931472, %v1593_v63 }
 0x2d0   : > { %v824_v38 = vrot.slane %v823_v6, 1  ;;  %vm929_vm12 = vcmp.eq.s32.totalorder %v1906_v31, %v923_v60 }
 0x2d1   : > { %v933_v14 = vsel %vm929_vm12, %v2181_v21, 0.0  ;;  %v2202_v11 = vsub.f32 %v1038_v10, %v1625_v26  ;;  %v1180_v45 = vadd.f32 %v1179_v35, %v2018_v36  ;;  %v1449_v36 = vsel %vm763_vm3, 1.0, %v1693_v2 }
 0x2d2   : > { %v825_v28 = vadd.f32 %v824_v38, %v823_v6  ;;  %v941_v3 = vsel %vm171_vm0, %v933_v14, 0.0  ;;  %v841_v40 = vsel %vm239_vm5, %v1449_v36, 0.0  ;;  %vm1047_vm3 = vcmp.ne.s32.totalorder %v2113_v55, 4294967295 }
 0x2d3   : > { %v1062_v12 = vpop.permute.xlu1 %1061  ;;  %v2215_v24 = vsub.f32 %v1180_v45, %v1626_v20  ;;  %v842_v6 = vrot.slane %v841_v40, 4 }
 0x2d4   : > { %v834_v44 = vmul.f32 %v1587_v37, %v825_v28  ;;  %vm1070_vm14 = vcmp.eq.s32.totalorder %v1906_v31, %v1062_v12 }
 0x2d5   : > { %919 = vperm.xlu0 %1526, %v2151_v17   ;;  %v1074_v27 = vsel %vm1070_vm14, %v2202_v11, 0.0  ;;  %v843_v38 = vadd.f32 %v842_v6, %v841_v40  ;;  %v1627_v40 = vld [vmem:[%s1790_s29 + $0x80] sm:$0xff]  ;;  %vm904_vm14 = vcmp.ne.s32.totalorder %v2151_v17, 4294967295 }
 0x2d6   : > { %v1080_v49 = vsel %vm171_vm0, %v1074_v27, 0.0  ;;  %vm761_vm12 = vcmp.ne.s32.totalorder %v1627_v40, 4294967295  ;;  %v1457_v6 = vsel %vm904_vm14, 1.0, %v1693_v2  ;;  %vm1190_vm14 = vcmp.ne.s32.totalorder %v2121_v32, 4294967295 }
 0x2d7   : > { %v1065_v7 = vpop.permute.xlu1 %1064  ;;  %v844_v28 = vrot.slane %v843_v38, 2 }
 0x2d8   : > { %vm1071_vm15 = vcmp.eq.s32.totalorder %v1906_v31, %v1065_v7 }
 0x2d9   : > { %925 = vperm.xlu0 %1526, %v2155_v18   ;;  %v1075_v62 = vsel %vm1071_vm15, %v2202_v11, 0.0  ;;  %v845_v37 = vadd.f32 %v844_v28, %v843_v38  ;;  %vm906_vm15 = vcmp.ne.s32.totalorder %v2155_v18, 4294967295  ;;  %v968_v28 = vsel %vm239_vm5, %v1457_v6, 0.0 }
 0x2da   : > { %v1083_v23 = vsel %vm171_vm0, %v1075_v62, 0.0 }
 0x2db   : > { %v1068_v13 = vpop.permute.xlu1 %1067 }
 0x2dc   : > { %vm1072_vm1 = vcmp.eq.s32.totalorder %v1906_v31, %v1068_v13  ;;  %v850_v13 = vrot.slane %v2176_v51, 4 }
 0x2dd   : > { %1203 = vperm.xlu0 %1526, %v2159_v59   ;;  %v1076_v5 = vsel %vm1072_vm1, %v2202_v11, 0.0  ;;  %vm905_vm1 = vcmp.ne.s32.totalorder %v2105_v47, 4294967295 }
 0x2de   : > { %v1086_v15 = vsel %vm171_vm0, %v1076_v5, 0.0 }
 0x2df   : > { %v1210_v57 = vpop.permute.xlu1 %1209 }
 0x2e0   : > { %vm1214_vm2 = vcmp.eq.s32.totalorder %v1906_v31, %v1210_v57 }
 0x2e1   : > { %1206 = vperm.xlu0 %1526, %v2163_v43   ;;  %v1218_v58 = vsel %vm1214_vm2, %v2215_v24, 0.0  ;;  %vm1046_vm2 = vcmp.ne.s32.totalorder %v2109_v19, 4294967295 }
 0x2e2   : > { %v1228_v39 = vsel %vm171_vm0, %v1218_v58, 0.0 }
 0x2e5   : > { %866 = vrot.lane.b32.xlu0 %v834_v44, %s1694_s30  ;;  %v846_v44 = vrot.slane %v845_v37, 1 }
 0x2e7   : > { %v847_v48 = vadd.f32 %v846_v44, %v845_v37  ;;  %v1459_v37 = vsel %vm906_vm15, 1.0, %v1693_v2 }
 0x2e9   : > { %916 = vperm.xlu0 %1526, %v2168_v1   ;;  %1594 = vrcp.f32 %v847_v48  ;;  %v969_v48 = vrot.slane %v968_v28, 4 }
 0x2ed   : > { %1200 = vperm.xlu0 %1526, %v2172_v46  }
 0x2f3   : > { %v1595_v33 = vpop.eup %1594 }
 0x30c   : > { %942 = vadd.xlane.f32.xlu0 %v941_v3  ;;  %v2225_v3 = vld [vmem:[%s1790_s29 + $0xc0] sm:$0xff] }
 0x30d   : > { %vm1045_vm15 = vcmp.ne.s32.totalorder %v2225_v3, 4294967295 }
 0x310   : > { %455 = vmin.xlane.f32.xlu0 %v454_v41  ;;  %v858_v41 = vadd.f32 %v857_v34, %v856_v0 }
 0x312   : > { %v859_v61 = vrot.slane %v858_v41, 2 }
 0x314   : > { %597 = vmin.xlane.f32.xlu0 %v596_v52  ;;  %v860_v63 = vadd.f32 %v859_v61, %v858_v41 }
 0x316   : > { %v861_v35 = vrot.slane %v860_v63, 1 }
 0x318   : > { %739 = vmin.xlane.f32.xlu0 %v738_v8  ;;  %v862_v57 = vadd.f32 %v861_v35, %v860_v63 }
 0x31a   : > { %1596 = vrcp.f32 %v862_v57 }
 0x31c   : > { %1081 = vadd.xlane.f32.xlu0 %v1080_v49  ;;  %v851_v49 = vadd.f32 %v850_v13, %v2176_v51  ;;  %v1447_v51 = vsel %vm761_vm12, 1.0, %v1693_v2  ;;  %vm1189_vm12 = vcmp.ne.s32.totalorder %v2163_v43, 4294967295 }
 0x31d   : > { %v811_v38 = vsel %vm239_vm5, %v1447_v51, 0.0 }
 0x31e   : > { %v812_v44 = vrot.slane %v811_v38, 4 }
 0x320   : > { %1084 = vadd.xlane.f32.xlu0 %v1083_v23  ;;  %v852_v23 = vrot.slane %v851_v49, 2 }
 0x322   : > { %v853_v20 = vadd.f32 %v852_v23, %v851_v49 }
 0x324   : > { %1087 = vadd.xlane.f32.xlu0 %v1086_v15  ;;  %v854_v15 = vrot.slane %v853_v20, 1 }
 0x326   : > { %v855_v58 = vadd.f32 %v854_v15, %v853_v20 }
 0x328   : > { %1229 = vadd.xlane.f32.xlu0 %v1228_v39  ;;  %v1597_v39 = vpop.eup %1596 }
 0x329   : > { %v864_v36 = vmul.f32 %v1597_v39, %v855_v58 }
 0x34c   : > { %v801_v30 = vpop.xlane.xlu0 %800 }
 0x34d   : > { %v835_v53 = vrot.slane %v801_v30, 4 }
 0x34f   : > { %v836_v60 = vadd.f32 %v835_v53, %v801_v30  ;;  %v998_v30 = vsel %vm239_vm5, %v1459_v37, 0.0  ;;  %v813_v53 = vadd.f32 %v812_v44, %v811_v38 }
 0x351   : > { %v837_v54 = vrot.slane %v836_v60, 2  ;;  %v814_v17 = vrot.slane %v813_v53, 2 }
 0x353   : > { %v838_v9 = vadd.f32 %v837_v54, %v836_v60  ;;  %v970_v60 = vadd.f32 %v969_v48, %v968_v28  ;;  %v999_v54 = vrot.slane %v998_v30, 4  ;;  %v1466_v28 = vsel %vm1046_vm2, 1.0, %v1693_v2 }
 0x354   : > { %v920_v12 = vpop.permute.xlu0 %919  ;;  %vm1312_vm2 = vcmask 31744  }
 0x355   : > { %v839_v14 = vrot.slane %v838_v9, 1  ;;  %vm928_vm6 = vcmp.eq.s32.totalorder %v1906_v31, %v920_v12  ;;  %v805_v12 = vrot.slane %v2130_v22, 4 }
 0x356   : > { %v932_v7 = vsel %vm928_vm6, %v2181_v21, 0.0 }
 0x357   : > { %v840_v42 = vadd.f32 %v839_v14, %v838_v9  ;;  %v938_v52 = vsel %vm171_vm0, %v932_v7, 0.0  ;;  %v971_v9 = vrot.slane %v970_v60, 2  ;;  %v1000_v14 = vadd.f32 %v999_v54, %v998_v30 }
 0x358   : > { %v926_v4 = vpop.permute.xlu0 %925  ;;  %v1110_v30 = vsel %vm239_vm5, %v1466_v28, 0.0 }
 0x359   : > { %v849_v25 = vmul.f32 %v1595_v33, %v840_v42  ;;  %vm930_vm7 = vcmp.eq.s32.totalorder %v1906_v31, %v926_v4  ;;  %v815_v42 = vadd.f32 %v814_v17, %v813_v53  ;;  %v1001_v18 = vrot.slane %v1000_v14, 2 }
 0x35a   : > { %v934_v26 = vsel %vm930_vm7, %v2181_v21, 0.0  ;;  %vm1048_vm7 = vcmp.ne.s32.totalorder %v2117_v16, 4294967295 }
 0x35b   : > { %870 = vrot.lane.b32.xlu1 %v849_v25, %s1695_s3  ;;  %v944_v56 = vsel %vm171_vm0, %v934_v26, 0.0  ;;  %v972_v25 = vadd.f32 %v971_v9, %v970_v60  ;;  %v816_v0 = vrot.slane %v815_v42, 1  ;;  %v1002_v4 = vadd.f32 %v1001_v18, %v1000_v14 }
 0x35c   : > { %v1204_v10 = vpop.permute.xlu0 %1203 }
 0x35d   : > { %vm1212_vm10 = vcmp.eq.s32.totalorder %v1906_v31, %v1204_v10  ;;  %v973_v34 = vrot.slane %v972_v25, 1  ;;  %v806_v10 = vadd.f32 %v805_v12, %v2130_v22  ;;  %v817_v7 = vadd.f32 %v816_v0, %v815_v42 }
 0x35e   : > { %v1216_v27 = vsel %vm1212_vm10, %v2215_v24, 0.0  ;;  %v1467_v42 = vsel %vm1047_vm3, 1.0, %v1693_v2  ;;  %v1111_v12 = vrot.slane %v1110_v30, 4  ;;  %vm1314_vm3 = vcmask 39936  }
 0x35f   : > { %1058 = vperm.xlu1 %1527, %v2225_v3   ;;  %v1222_v62 = vsel %vm171_vm0, %v1216_v27, 0.0  ;;  %v974_v61 = vadd.f32 %v973_v34, %v972_v25  ;;  %v807_v63 = vrot.slane %v806_v10, 2  ;;  %1598 = vrcp.f32 %v817_v7 }
 0x360   : > { %v1207_v8 = vpop.permute.xlu0 %1206 }
 0x361   : > { %vm1213_vm11 = vcmp.eq.s32.totalorder %v1906_v31, %v1207_v8  ;;  %1600 = vrcp.f32 %v974_v61  ;;  %v808_v27 = vadd.f32 %v807_v63, %v806_v10  ;;  %v1125_v10 = vsel %vm239_vm5, %v1467_v42, 0.0 }
 0x362   : > { %v1217_v45 = vsel %vm1213_vm11, %v2215_v24, 0.0 }
 0x363   : > { %v1225_v5 = vsel %vm171_vm0, %v1217_v45, 0.0  ;;  %v1458_v45 = vsel %vm905_vm1, 1.0, %v1693_v2  ;;  %v809_v57 = vrot.slane %v808_v27, 1  ;;  %vm1187_vm1 = vcmp.ne.s32.totalorder %v2172_v46, 4294967295 }
 0x364   : > { %v867_v33 = vpop.permute.xlu0 %866  ;;  %v983_v58 = vsel %vm239_vm5, %v1458_v45, 0.0 }
 0x365   : > { %v810_v40 = vadd.f32 %v809_v57, %v808_v27  ;;  %v984_v37 = vrot.slane %v983_v58, 4 }
 0x367   : > { %v985_v14 = vadd.f32 %v984_v37, %v983_v58 }
 0x368   : > { %v2258_v41 = vpop.permute.xlu0 %916 }
 0x369   : > { %v1599_v47 = vpop.eup %1598  ;;  %vm927_vm6 = vcmp.eq.s32.totalorder %v1906_v31, %v2258_v41  ;;  %v986_v59 = vrot.slane %v985_v14, 2  ;;  %v1126_v41 = vrot.slane %v1125_v10, 4 }
 0x36a   : > { %v819_v53 = vmul.f32 %v1599_v47, %v810_v40  ;;  %v931_v61 = vsel %vm927_vm6, %v2181_v21, 0.0  ;;  %v1477_v40 = vsel %vm1190_vm14, 1.0, %v1693_v2  ;;  %vm1318_vm6 = vcmask 56320  }
 0x36b   : > { %v1601_v38 = vpop.eup %1600  ;;  %v987_v27 = vadd.f32 %v986_v59, %v985_v14  ;;  %v1127_v16 = vadd.f32 %v1126_v41, %v1125_v10 }
 0x36c   : > { %v2265_v8 = vpop.permute.xlu0 %1200  ;;  %v877_v25 = vsel %vm239_vm5, %v819_v53, %v867_v33  ;;  %v1475_v33 = vsel %vm1188_vm4, 1.0, %v1693_v2  ;;  %vm1316_vm4 = vcmask 48128  }
 0x36d   : > { %v1252_v63 = vsel %vm239_vm5, %v1475_v33, 0.0  ;;  %vm1211_vm11 = vcmp.eq.s32.totalorder %v1906_v31, %v2265_v8  ;;  %v1128_v8 = vrot.slane %v1127_v16, 2 }
 0x36f   : > { %v1129_v28 = vadd.f32 %v1128_v8, %v1127_v16 }
 0x383   : > { %313 = vmin.xlane.f32.xlu1 %v312_v50 }
 0x387   : > { %939 = vadd.xlane.f32.xlu1 %v938_v52  ;;  %v1003_v52 = vrot.slane %v1002_v4, 1 }
 0x389   : > { %v1004_v13 = vadd.f32 %v1003_v52, %v1002_v4  ;;  %v1112_v52 = vadd.f32 %v1111_v12, %v1110_v30 }
 0x38b   : > { %945 = vadd.xlane.f32.xlu1 %v944_v56  ;;  %1602 = vrcp.f32 %v1004_v13  ;;  %v935_v13 = vsel %vm171_vm0, %v931_v61, 0.0 }
 0x38f   : > { %1223 = vadd.xlane.f32.xlu1 %v1222_v62 }
 0x393   : > { %1226 = vadd.xlane.f32.xlu1 %v1225_v5 }
 0x395   : > { %v1603_v17 = vpop.eup %1602 }
 0x399   : > { %v2268_v49 = vpop.xlane.xlu0 %942 }
 0x39d   : > { %v2273_v39 = vpop.xlane.xlu0 %455 }
 0x3a1   : > { %v2282_v9 = vpop.xlane.xlu0 %597 }
 0x3a4   : > { %874 = vrot.lane.b32.xlu1 %v864_v36, %s1696_s4 }
 0x3cd   : > { %v871_v29 = vpop.permute.xlu1 %870 }
 0x3ce   : > { %v878_v55 = vsel %vm307_vm8, %v877_v25, %v871_v29  ;;  %v2298_v29 = vpop.xlane.xlu0 %739 }
 0x3d2   : > { %v1082_v45 = vpop.xlane.xlu0 %1081 }
 0x3d3   : > { %v1104_v58 = vrot.slane %v1082_v45, 4 }
 0x3d5   : > { %v1105_v53 = vadd.f32 %v1104_v58, %v1082_v45 }
 0x3d7   : > { %v1106_v12 = vrot.slane %v1105_v53, 2 }
 0x3de   : > { %v2260_v50 = vpop.permute.xlu1 %1058 }
 0x3df   : > { %vm1069_vm10 = vcmp.eq.s32.totalorder %v1906_v31, %v2260_v50  ;;  %v1476_v31 = vsel %vm1189_vm12, 1.0, %v1693_v2 }
 0x3e0   : > { %v1073_v21 = vsel %vm1069_vm10, %v2202_v11, 0.0  ;;  %v988_v11 = vrot.slane %v987_v27, 1 }
 0x3e1   : > { %v1077_v57 = vsel %vm171_vm0, %v1073_v21, 0.0 }
 0x410   : > { %v2263_v26 = vpop.xlane.xlu1 %313 }
 0x414   : > { %v940_v56 = vpop.xlane.xlu1 %939 }
 0x415   : > { %v962_v35 = vrot.slane %v940_v56, 4 }
 0x417   : > { %v963_v62 = vadd.f32 %v962_v35, %v940_v56  ;;  %v1468_v56 = vsel %vm1048_vm7, 1.0, %v1693_v2  ;;  %v1113_v35 = vrot.slane %v1112_v52, 2 }
 0x418   : > { %v946_v22 = vpop.xlane.xlu1 %945  ;;  %v1140_v50 = vsel %vm239_vm5, %v1468_v56, 0.0 }
 0x419   : > { %v964_v23 = vrot.slane %v963_v62, 2  ;;  %v992_v5 = vrot.slane %v946_v22, 4 }
 0x41b   : > { %v965_v20 = vadd.f32 %v964_v23, %v963_v62  ;;  %v993_v15 = vadd.f32 %v992_v5, %v946_v22  ;;  %v1253_v62 = vrot.slane %v1252_v63, 4  ;;  %v977_v22 = vrot.slane %v2268_v49, 4 }
 0x41c   : > { %v2275_v36 = vpop.xlane.xlu1 %1223  ;;  %v1215_v23 = vsel %vm1211_vm11, %v2215_v24, 0.0  ;;  %v1114_v5 = vadd.f32 %v1113_v35, %v1112_v52  ;;  %v989_v24 = vadd.f32 %v988_v11, %v987_v27  ;;  %v1107_v52 = vadd.f32 %v1106_v12, %v1105_v53 }
 0x41d   : > { %v966_v51 = vrot.slane %v965_v20, 1  ;;  %v994_v6 = vrot.slane %v993_v15, 2  ;;  %v978_v43 = vadd.f32 %v977_v22, %v2268_v49  ;;  %v1219_v47 = vsel %vm171_vm0, %v1215_v23, 0.0 }
 0x41e   : > { %1604 = vrcp.f32 %v989_v24  ;;  %vm903_vm0 = vcmp.ne.s32.totalorder %v2168_v1, 4294967295  ;;  %v1474_v1 = vsel %vm1187_vm1, 1.0, %v1693_v2 }
 0x41f   : > { %v967_v44 = vadd.f32 %v966_v51, %v965_v20  ;;  %v995_v48 = vadd.f32 %v994_v6, %v993_v15  ;;  %v1141_v20 = vrot.slane %v1140_v50, 4  ;;  %v1254_v15 = vadd.f32 %v1253_v62, %v1252_v63 }
 0x420   : > { %v2279_v19 = vpop.xlane.xlu1 %1226  ;;  %v1267_v51 = vsel %vm239_vm5, %v1476_v31, 0.0  ;;  %v1115_v6 = vrot.slane %v1114_v5, 1  ;;  %v979_v30 = vrot.slane %v978_v43, 2 }
 0x421   : > { %v996_v60 = vrot.slane %v995_v48, 1  ;;  %v976_v54 = vmul.f32 %v1601_v38, %v967_v44  ;;  %v1085_v38 = vpop.xlane.xlu0 %1084  ;;  %v1142_v32 = vadd.f32 %v1141_v20, %v1140_v50  ;;  %v1255_v37 = vrot.slane %v1254_v15, 2 }
 0x422   : > { %v1282_v44 = vsel %vm239_vm5, %v1477_v40, 0.0  ;;  %v1119_v49 = vrot.slane %v1085_v38, 4  ;;  %v1108_v50 = vrot.slane %v1107_v52, 1  ;;  %v1261_v23 = vrot.slane %v2279_v19, 4 }
 0x423   : > { %v997_v18 = vadd.f32 %v996_v60, %v995_v48  ;;  %1008 = vrot.lane.b32.xlu1 %v976_v54, %s1694_s30  ;;  %v1268_v48 = vrot.slane %v1267_v51, 4  ;;  %v1116_v60 = vadd.f32 %v1115_v6, %v1114_v5  ;;  %v1130_v54 = vrot.slane %v1129_v28, 1 }
 0x424   : > { %v875_v0 = vpop.permute.xlu1 %874  ;;  %v1283_v14 = vrot.slane %v1282_v44, 4  ;;  %v1256_v42 = vadd.f32 %v1255_v37, %v1254_v15 }
 0x425   : > { %v879_v34 = vsel %vm309_vm9, %v878_v55, %v875_v0  ;;  %v1006_v4 = vmul.f32 %v1603_v17, %v997_v18  ;;  %v1143_v17 = vrot.slane %v1142_v32, 2  ;;  %v1269_v25 = vadd.f32 %v1268_v48, %v1267_v51  ;;  %v1088_v0 = vpop.xlane.xlu0 %1087 }
 0x426   : > { %v880_v7 = vsel %vm311_vm13, %v879_v34, inf  ;;  %v980_v18 = vadd.f32 %v979_v30, %v978_v43  ;;  %v1120_v55 = vadd.f32 %v1119_v49, %v1085_v38  ;;  %v1246_v34 = vrot.slane %v2275_v36, 4 }
 0x427   : > { %1016 = vrot.lane.b32.xlu1 %v1006_v4, %s1696_s4  ;;  %881 = vmin.xlane.f32.xlu0 %v880_v7  ;;  %1606 = vrcp.f32 %v1116_v60  ;;  %v1131_v4 = vadd.f32 %v1130_v54, %v1129_v28  ;;  %v1144_v10 = vadd.f32 %v1143_v17, %v1142_v32  ;;  %v1284_v7 = vadd.f32 %v1283_v14, %v1282_v44 }
 0x428   : > { %v1257_v33 = vrot.slane %v1256_v42, 1  ;;  %v1270_v61 = vrot.slane %v1269_v25, 2  ;;  %v981_v59 = vrot.slane %v980_v18, 1  ;;  %v1134_v41 = vrot.slane %v1088_v0, 4  ;;  %v1605_v35 = vpop.eup %1604 }
 0x429   : > { %v1121_v63 = vrot.slane %v1120_v55, 2  ;;  %1608 = vrcp.f32 %v1131_v4  ;;  %v1145_v56 = vrot.slane %v1144_v10, 1  ;;  %v1285_v21 = vrot.slane %v1284_v7, 2  ;;  %v1230_v11 = vpop.xlane.xlu0 %1229 }
 0x42a   : > { %v1258_v27 = vadd.f32 %v1257_v33, %v1256_v42  ;;  %v1271_v16 = vadd.f32 %v1270_v61, %v1269_v25  ;;  %v982_v62 = vadd.f32 %v981_v59, %v980_v18  ;;  %v1135_v22 = vadd.f32 %v1134_v41, %v1088_v0 }
 0x42b   : > { %936 = vadd.xlane.f32.xlu0 %v935_v13  ;;  %v1247_v13 = vadd.f32 %v1246_v34, %v2275_v36  ;;  %v1122_v45 = vadd.f32 %v1121_v63, %v1120_v55  ;;  %v1146_v5 = vadd.f32 %v1145_v56, %v1144_v10  ;;  %v1286_v31 = vadd.f32 %v1285_v21, %v1284_v7 }
 0x42c   : > { %1610 = vrcp.f32 %v1258_v27  ;;  %v1272_v20 = vrot.slane %v1271_v16, 1  ;;  %v1109_v36 = vadd.f32 %v1108_v50, %v1107_v52  ;;  %v1136_v15 = vrot.slane %v1135_v22, 2 }
 0x42d   : > { %v991_v43 = vmul.f32 %v1605_v35, %v982_v62  ;;  %v1123_v58 = vrot.slane %v1122_v45, 1  ;;  %v1262_v51 = vadd.f32 %v1261_v23, %v2279_v19  ;;  %1612 = vrcp.f32 %v1146_v5 }
 0x42e   : > { %v1287_v24 = vrot.slane %v1286_v31, 1  ;;  %v1273_v6 = vadd.f32 %v1272_v20, %v1271_v16  ;;  %v1137_v38 = vadd.f32 %v1136_v15, %v1135_v22  ;;  %v1456_v52 = vsel %vm903_vm0, 1.0, %v1693_v2 }
 0x42f   : > { %1078 = vadd.xlane.f32.xlu0 %v1077_v57  ;;  %v1248_v57 = vrot.slane %v1247_v13, 2  ;;  %v1124_v37 = vadd.f32 %v1123_v58, %v1122_v45  ;;  %v1263_v30 = vrot.slane %v1262_v51, 2  ;;  %v953_v41 = vsel %vm239_vm5, %v1456_v52, 0.0 }
 0x430   : > { %v1288_v53 = vadd.f32 %v1287_v24, %v1286_v31  ;;  %1614 = vrcp.f32 %v1273_v6  ;;  %v1138_v49 = vrot.slane %v1137_v38, 1  ;;  %v954_v63 = vrot.slane %v953_v41, 4 }
 0x431   : > { %v1607_v8 = vpop.eup %1606  ;;  %v1249_v40 = vadd.f32 %v1248_v57, %v1247_v13  ;;  %v1264_v17 = vadd.f32 %v1263_v30, %v1262_v51  ;;  %v1465_v13 = vsel %vm1045_vm15, 1.0, %v1693_v2  ;;  %v1309_v50 = vsel %vm239_vm5, %v2263_v26, %v2273_v39 }
 0x432   : > { %v1118_v28 = vmul.f32 %v1607_v8, %v1109_v36  ;;  %1616 = vrcp.f32 %v1288_v53  ;;  %v1139_v25 = vadd.f32 %v1138_v49, %v1137_v38  ;;  %v955_v56 = vadd.f32 %v954_v63, %v953_v41 }
 0x433   : > { %1220 = vadd.xlane.f32.xlu0 %v1219_v47  ;;  %v1276_v47 = vrot.slane %v1230_v11, 4  ;;  %v1609_v32 = vpop.eup %1608  ;;  %v1250_v48 = vrot.slane %v1249_v40, 1  ;;  %v1265_v12 = vrot.slane %v1264_v17, 1  ;;  %v1095_v21 = vsel %vm239_vm5, %v1465_v13, 0.0 }
 0x434   : > { %v1133_v14 = vmul.f32 %v1609_v32, %v1124_v37  ;;  %v956_v27 = vrot.slane %v955_v56, 2  ;;  %v1096_v35 = vrot.slane %v1095_v21, 4  ;;  %v1237_v45 = vsel %vm239_vm5, %v1474_v1, 0.0 }
 0x435   : > { %v1277_v44 = vadd.f32 %v1276_v47, %v1230_v11  ;;  %v1251_v19 = vadd.f32 %v1250_v48, %v1249_v40  ;;  %v1266_v34 = vadd.f32 %v1265_v12, %v1264_v17  ;;  %v1310_v57 = vsel %vm307_vm8, %v1309_v50, %v2282_v9 }
 0x436   : > { %v1611_v60 = vpop.eup %1610  ;;  %v957_v16 = vadd.f32 %v956_v27, %v955_v56  ;;  %v1097_v62 = vadd.f32 %v1096_v35, %v1095_v21  ;;  %v1238_v11 = vrot.slane %v1237_v45, 4  ;;  %v1311_v46 = vsel %vm309_vm9, %v1310_v57, %v2298_v29 }
 0x437   : > { %v1278_v54 = vrot.slane %v1277_v44, 2  ;;  %v1613_v42 = vpop.eup %1612  ;;  %v1260_v55 = vmul.f32 %v1611_v60, %v1251_v19 }
 0x438   : > { %v1148_v4 = vmul.f32 %v1613_v42, %v1139_v25  ;;  %v958_v22 = vrot.slane %v957_v16, 1  ;;  %v1098_v3 = vrot.slane %v1097_v62, 2  ;;  %v1239_v8 = vadd.f32 %v1238_v11, %v1237_v45 }
 0x439   : > { %v1279_v18 = vadd.f32 %v1278_v54, %v1277_v44 }
 0x43a   : > { %v1615_v10 = vpop.eup %1614  ;;  %v959_v23 = vadd.f32 %v958_v22, %v957_v16  ;;  %v1099_v5 = vadd.f32 %v1098_v3, %v1097_v62  ;;  %v1240_v15 = vrot.slane %v1239_v8, 2 }
 0x43b   : > { %v1280_v0 = vrot.slane %v1279_v18, 1  ;;  %v1275_v33 = vmul.f32 %v1615_v10, %v1266_v34 }
 0x43c   : > { %v1617_v61 = vpop.eup %1616  ;;  %1618 = vrcp.f32 %v959_v23  ;;  %v1100_v26 = vrot.slane %v1099_v5, 1  ;;  %v1241_v24 = vadd.f32 %v1240_v15, %v1239_v8 }
 0x43d   : > { %v1281_v7 = vadd.f32 %v1280_v0, %v1279_v18 }
 0x43e   : > { %v1242_v30 = vrot.slane %v1241_v24, 1 }
 0x43f   : > { %v1290_v59 = vmul.f32 %v1617_v61, %v1281_v7 }
 0x440   : > { %v1243_v17 = vadd.f32 %v1242_v30, %v1241_v24 }
 0x446   : > { %v1619_v32 = vpop.eup %1618 }
 0x449   : > { %1012 = vrot.lane.b32.xlu0 %v991_v43, %s1695_s3  ;;  %v1101_v43 = vadd.f32 %v1100_v26, %v1099_v5 }
 0x44b   : > { %1620 = vrcp.f32 %v1101_v43 }
 0x44c   : > { %1622 = vrcp.f32 %v1243_v17 }
 0x44d   : > { %1150 = vrot.lane.b32.xlu0 %v1118_v28, %s1694_s30 }
 0x451   : > { %1154 = vrot.lane.b32.xlu0 %v1133_v14, %s1695_s3 }
 0x455   : > { %1292 = vrot.lane.b32.xlu0 %v1260_v55, %s1694_s30  ;;  %v1621_v0 = vpop.eup %1620 }
 0x456   : > { %v1623_v56 = vpop.eup %1622 }
 0x459   : > { %1158 = vrot.lane.b32.xlu0 %v1148_v4, %s1696_s4 }
 0x45d   : > { %1296 = vrot.lane.b32.xlu0 %v1275_v33, %s1695_s3 }
 0x461   : > { %1300 = vrot.lane.b32.xlu0 %v1290_v59, %s1696_s4 }
 0x495   : > { %v1009_v37 = vpop.permute.xlu1 %1008 }
 0x499   : > { %v1017_v14 = vpop.permute.xlu1 %1016 }
 0x4b4   : > { %v882_v31 = vpop.xlane.xlu0 %881 }
 0x4b5   : > { %v2347_v2 = vsel %vm1312_vm2, %v1311_v46, %v882_v31 }
 0x4b8   : > { %v937_v39 = vpop.xlane.xlu0 %936 }
 0x4b9   : > { %v947_v20 = vrot.slane %v937_v39, 4 }
 0x4bb   : > { %v948_v36 = vadd.f32 %v947_v20, %v937_v39 }
 0x4bc   : > { %v1079_v58 = vpop.xlane.xlu0 %1078 }
 0x4bd   : > { %v949_v9 = vrot.slane %v948_v36, 2  ;;  %v1089_v47 = vrot.slane %v1079_v58, 4 }
 0x4bf   : > { %v950_v40 = vadd.f32 %v949_v9, %v948_v36  ;;  %v1090_v51 = vadd.f32 %v1089_v47, %v1079_v58 }
 0x4c0   : > { %v1221_v6 = vpop.xlane.xlu0 %1220 }
 0x4c1   : > { %v951_v29 = vrot.slane %v950_v40, 1  ;;  %v1091_v38 = vrot.slane %v1090_v51, 2  ;;  %v1231_v28 = vrot.slane %v1221_v6, 4 }
 0x4c3   : > { %v952_v44 = vadd.f32 %v951_v29, %v950_v40  ;;  %v1092_v48 = vadd.f32 %v1091_v38, %v1090_v51  ;;  %v1232_v54 = vadd.f32 %v1231_v28, %v1221_v6 }
 0x4c4   : > { %v1013_v53 = vpop.permute.xlu0 %1012 }
 0x4c5   : > { %v961_v49 = vmul.f32 %v1619_v32, %v952_v44  ;;  %v1093_v60 = vrot.slane %v1092_v48, 1  ;;  %v1233_v12 = vrot.slane %v1232_v54, 2 }
 0x4c7   : > { %v1019_v19 = vsel %vm239_vm5, %v961_v49, %v1009_v37  ;;  %v1094_v18 = vadd.f32 %v1093_v60, %v1092_v48  ;;  %v1234_v10 = vadd.f32 %v1233_v12, %v1232_v54 }
 0x4c8   : > { %v1020_v42 = vsel %vm307_vm8, %v1019_v19, %v1013_v53  ;;  %v1151_v25 = vpop.permute.xlu0 %1150 }
 0x4c9   : > { %v1021_v55 = vsel %vm309_vm9, %v1020_v42, %v1017_v14  ;;  %v1103_v7 = vmul.f32 %v1621_v0, %v1094_v18  ;;  %v1235_v61 = vrot.slane %v1234_v10, 1 }
 0x4ca   : > { %v1022_v34 = vsel %vm311_vm13, %v1021_v55, inf }
 0x4cb   : > { %1023 = vmin.xlane.f32.xlu1 %v1022_v34  ;;  %v1161_v59 = vsel %vm239_vm5, %v1103_v7, %v1151_v25  ;;  %v1236_v63 = vadd.f32 %v1235_v61, %v1234_v10 }
 0x4cc   : > { %v1155_v4 = vpop.permute.xlu0 %1154 }
 0x4cd   : > { %v1162_v52 = vsel %vm307_vm8, %v1161_v59, %v1155_v4  ;;  %v1245_v35 = vmul.f32 %v1623_v56, %v1236_v63 }
 0x4d0   : > { %v1293_v33 = vpop.permute.xlu0 %1292 }
 0x4d1   : > { %v1303_v16 = vsel %vm239_vm5, %v1245_v35, %v1293_v33  ;;  %vm1320_vm5 = vcmask 57344  }
 0x4d4   : > { %v1159_v41 = vpop.permute.xlu0 %1158 }
 0x4d5   : > { %v1163_v13 = vsel %vm309_vm9, %v1162_v52, %v1159_v41 }
 0x4d6   : > { %v1164_v21 = vsel %vm311_vm13, %v1163_v13, inf }
 0x4d7   : > { %1165 = vmin.xlane.f32.xlu1 %v1164_v21 }
 0x4d8   : > { %v1297_v27 = vpop.permute.xlu0 %1296 }
 0x4d9   : > { %v1304_v62 = vsel %vm307_vm8, %v1303_v16, %v1297_v27 }
 0x4dc   : > { %v1301_v1 = vpop.permute.xlu0 %1300 }
 0x4dd   : > { %v1305_v50 = vsel %vm309_vm9, %v1304_v62, %v1301_v1 }
 0x4de   : > { %v1306_v22 = vsel %vm311_vm13, %v1305_v50, inf }
 0x4df   : > { %1307 = vmin.xlane.f32.xlu0 %v1306_v22 }
 0x558   : > { %v1024_v3 = vpop.xlane.xlu1 %1023 }
 0x559   : > { %v1315_v57 = vsel %vm1314_vm3, %v2347_v2, %v1024_v3 }
 0x564   : > { %v1166_v45 = vpop.xlane.xlu1 %1165 }
 0x565   : > { %v1317_v23 = vsel %vm1316_vm4, %v1315_v57, %v1166_v45 }
 0x56c   : > { %v1308_v11 = vpop.xlane.xlu0 %1307 }
 0x56d   : > { %v1319_v5 = vsel %vm1318_vm6, %v1317_v23, %v1308_v11 }
 0x56e   : > { %1321 = vst.msk [vmem:[%s154_s7] sm:$0x1] %vm1320_vm5, %v1319_v5 }
 0x56f   : > { %1641 = shalt.err (!%p1638_p3)
}
 0x570   : > { %s1642_s25 = scalar_lea.hbm %s2367_s17, 16  ;;  %s1646_s28 = scalar_lea.hbm %s2411_s2, 32 }
 0x571   : > { %p1643_p4 = scmp.ne.s32.totalorder %s2367_s17, %s1642_s25  ;;  %p1647_p9 = scmp.lt.u32.totalorder %s2367_s17, %s2411_s2 }
 0x572   : > { %p1648_p10 = scmp.lt.u32.totalorder %s1646_s28, %s1642_s25  ;;  %p1650_p12 = scmp.lt.u32.totalorder %s1642_s25, %s2367_s17 }
 0x573   : > { %p1644_p7 = pnand %p1643_p4, %p1751_p5 }
 0x574   : > { %p1649_p11 = por %p1648_p10, %p1647_p9 }
 0x575   : > { %p1645_p8 = pneg %p1644_p7 }
 0x576   : > { %p1651_p13 = por %p1650_p12, %p1649_p11 }
 0x578   : > { %p1652_p0 = pnand %p1651_p13, %p1645_p8 }
 0x57a   : > { %1655 = shalt.err (!%p1652_p0)
}
 0x57b   : > { %1482 = dma.vmem_to_hbm [thread:$0]  (%p1751_p5), %s2369_s8, 16, %s2367_s17, %s1323_s13  }
 0x57c PF: > { %p1488_p1 = scmp.ge.s32.totalorder %s1690_s12, 2  ;;  %s1347_s3 = sand.u32 1, %s1678_s9  }
 0x57d   : > { %s1348_s4 = scalar_lea.sflag [#allocation3], %s1347_s3 }
 0x57e   : > { %p1485_p2 = pnand %p1488_p1, %p1755_p6 }
 0x580   : > { %1673 = dma.done.wait (!%p1485_p2), %s1348_s4, 16  }
 0x581   : > { %1675 = vsyncadd (!%p1485_p2), %s1348_s4, 4294967280  ;;  %p12_p3 = scmp.ge.s32.totalorder %s1738_s15, 4   ;;  %s2414_s9 = smov %s1682_s10 }
 0x582   : > { %s2415_s10 = smov %s1686_s11  ;;  %s2416_s11 = smov %s1749_s18 }
 0x583   : > { %s2417_s12 = smov %s1738_s15  ;;  %14 = sbr.rel (!%p12_p3) target bundleno = 3 (0x3), region = 80 }
 0x58a   :  { %1352 = vsyncpa [#allocation3], 1 }
 0x58b   :  { %1354 = vsyncpa [#allocation3 + $0x1], 1 }

</bundles_post_ra>
